<compile_context>
chip_gen: v7x
topology: tpu7x:2x2x1
jax: 0.10.0
libtpu: 0.0.40
codegen_flags: <defaults>
</compile_context>

<pallas_src>
import math
import jax
import jax.numpy as jnp
import numpy as np
from jax import lax
from jax.experimental import pallas as pl
from jax.experimental.pallas import tpu as pltpu

# --- small, module-consistent shapes ---
B, T, C = 2, 16, 64        # batch, seq, n_embd
H = 4                      # n_head
D = C // H                 # head dim
BT = B * T                 # batch folded into rows for the dense projections
EPS = 1e-5                 # torch.nn.LayerNorm default eps
GELU_C = math.sqrt(2.0 / math.pi)
NEG = -1e30                # additive mask; safe with f32 scores + max-subtraction


def _layernorm(x, w, b):
    mu = jnp.mean(x, axis=-1, keepdims=True)
    var = jnp.mean((x - mu) ** 2, axis=-1, keepdims=True)
    return (x - mu) * lax.rsqrt(var + EPS) * w + b


def _new_gelu(x):
    return 0.5 * x * (1.0 + jnp.tanh(GELU_C * (x + 0.044715 * x * x * x)))


def block_kernel(x_ref,
                 ln1w_ref, ln1b_ref,
                 wqkv_ref, bqkv_ref,
                 wproj_ref, bproj_ref,
                 ln2w_ref, ln2b_ref,
                 wfc_ref, bfc_ref, wfc2_ref, bfc2_ref,
                 out_ref):
    x = x_ref[...]                                              # (BT, C) f32

    # ---- ln_1 ----
    h1 = _layernorm(x, ln1w_ref[...], ln1b_ref[...])            # (BT, C) f32

    # ---- fused QKV projection: one (BT,C) x (C,3C) MXU matmul ----
    qkv = jnp.dot(h1.astype(jnp.bfloat16), wqkv_ref[...],
                  preferred_element_type=jnp.float32) + bqkv_ref[...]   # (BT, 3C) f32

    # ---- split into per-(batch, head) (T, D) tiles: static slices + concat only ----
    def to_bh(off):
        parts = [qkv[b * T:(b + 1) * T, off + h * D: off + (h + 1) * D][None]
                 for b in range(B) for h in range(H)]
        return jnp.concatenate(parts, axis=0).astype(jnp.bfloat16)      # (B*H, T, D)

    qh = to_bh(0)          # 1/sqrt(D) already folded into the Q weight/bias
    kh = to_bh(C)
    vh = to_bh(2 * C)

    # ---- attention scores (B*H, T, T), causal mask, softmax ----
    s = jnp.einsum('bqd,bkd->bqk', qh, kh, preferred_element_type=jnp.float32)
    row = lax.broadcasted_iota(jnp.int32, (T, T), 0)
    col = lax.broadcasted_iota(jnp.int32, (T, T), 1)
    s = s + jnp.where(row >= col, 0.0, NEG).astype(jnp.float32)
    s = s - jnp.max(s, axis=-1, keepdims=True)
    p = jnp.exp(s)
    p = p / jnp.sum(p, axis=-1, keepdims=True)                  # exact divide (cheap at this size)

    # ---- attention values (B*H, T, D) ----
    y = jnp.einsum('bqk,bkd->bqd', p.astype(jnp.bfloat16), vh,
                   preferred_element_type=jnp.float32)

    # ---- merge heads back into lanes: (B*H, T, D) -> (BT, C) ----
    y_bt = jnp.concatenate(
        [jnp.concatenate([y[b * H + h] for h in range(H)], axis=-1) for b in range(B)],
        axis=0)                                                 # (BT, C) f32

    # ---- fused output projection: one (BT,C) x (C,C) matmul contracting all H*D jointly ----
    attn = jnp.dot(y_bt.astype(jnp.bfloat16), wproj_ref[...],
                   preferred_element_type=jnp.float32) + bproj_ref[...]
    x = x + attn

    # ---- ln_2 + MLP (c_fc -> NewGELU -> c_proj) + residual ----
    h2 = _layernorm(x, ln2w_ref[...], ln2b_ref[...])
    f = jnp.dot(h2.astype(jnp.bfloat16), wfc_ref[...],
                preferred_element_type=jnp.float32) + bfc_ref[...]
    g = _new_gelu(f)
    m = jnp.dot(g.astype(jnp.bfloat16), wfc2_ref[...],
                preferred_element_type=jnp.float32) + bfc2_ref[...]

    out_ref[...] = (x + m).astype(out_ref.dtype)


@jax.jit
def minigpt_block(x, params):
    """x: (B, T, C) float32. params: dict of f32 weights (same layout as the reference)."""
    scale = 1.0 / math.sqrt(D)
    # fold the attention scale into the Q columns of the fused QKV weight/bias
    col_scale = jnp.concatenate([jnp.full((C,), scale, jnp.float32),
                                 jnp.ones((2 * C,), jnp.float32)])
    w_qkv = (params["w_qkv"] * col_scale[None, :]).astype(jnp.bfloat16)   # (C, 3C) bf16
    b_qkv = params["b_qkv"] * col_scale[None, :]                          # (1, 3C) f32

    args = [
        x.reshape(BT, C),
        params["ln1_w"], params["ln1_b"],
        w_qkv, b_qkv,
        params["w_proj"].astype(jnp.bfloat16), params["b_proj"],
        params["ln2_w"], params["ln2_b"],
        params["w_fc"].astype(jnp.bfloat16), params["b_fc"],
        params["w_fc_proj"].astype(jnp.bfloat16), params["b_fc_proj"],
    ]

    vmem = pltpu.MemorySpace.VMEM
    out = pl.pallas_call(
        block_kernel,
        out_shape=jax.ShapeDtypeStruct((BT, C), x.dtype),
        in_specs=[pl.BlockSpec(memory_space=vmem) for _ in args],
        out_specs=pl.BlockSpec(memory_space=vmem),
        input_output_aliases={0: 0},      # reuse the activation buffer for the output
    )(*args)
    return out.reshape(B, T, C)


# ---------- pure-JAX reference (mirrors the PyTorch forward, f32 throughout) ----------
def reference_block(x, p):
    def ln(z, w, b):
        mu = jnp.mean(z, axis=-1, keepdims=True)
        var = jnp.mean((z - mu) ** 2, axis=-1, keepdims=True)
        return (z - mu) / jnp.sqrt(var + EPS) * w[0] + b[0]

    h1 = ln(x, p["ln1_w"], p["ln1_b"])
    qkv = h1 @ p["w_qkv"] + p["b_qkv"][0]
    q, k, v = qkv[..., :C], qkv[..., C:2 * C], qkv[..., 2 * C:]
    q = q.reshape(B, T, H, D).transpose(0, 2, 1, 3)
    k = k.reshape(B, T, H, D).transpose(0, 2, 1, 3)
    v = v.reshape(B, T, H, D).transpose(0, 2, 1, 3)
    att = (q @ k.transpose(0, 1, 3, 2)) / math.sqrt(D)
    mask = jnp.tril(jnp.ones((T, T), dtype=bool))
    att = jnp.where(mask[None, None], att, -jnp.inf)
    att = jax.nn.softmax(att, axis=-1)
    y = (att @ v).transpose(0, 2, 1, 3).reshape(B, T, C)
    x = x + (y @ p["w_proj"] + p["b_proj"][0])

    h2 = ln(x, p["ln2_w"], p["ln2_b"])
    f = h2 @ p["w_fc"] + p["b_fc"][0]
    f = 0.5 * f * (1.0 + jnp.tanh(GELU_C * (f + 0.044715 * f ** 3)))
    return x + (f @ p["w_fc_proj"] + p["b_fc_proj"][0])


if __name__ == "__main__":
    key = jax.random.PRNGKey(0)
    keys = jax.random.split(key, 8)

    # deterministic parameter init (weights stored pre-transposed as (in, out) so kernel does x @ W)
    params = {
        "ln1_w": jnp.ones((1, C), jnp.float32),
        "ln1_b": jnp.zeros((1, C), jnp.float32),
        "ln2_w": jnp.ones((1, C), jnp.float32),
        "ln2_b": jnp.zeros((1, C), jnp.float32),
        "w_qkv": 0.02 * jax.random.normal(keys[0], (C, 3 * C), jnp.float32),
        "b_qkv": 0.01 * jax.random.normal(keys[1], (1, 3 * C), jnp.float32),
        "w_proj": 0.02 * jax.random.normal(keys[2], (C, C), jnp.float32),
        "b_proj": 0.01 * jax.random.normal(keys[3], (1, C), jnp.float32),
        "w_fc": 0.02 * jax.random.normal(keys[4], (C, 4 * C), jnp.float32),
        "b_fc": 0.01 * jax.random.normal(keys[5], (1, 4 * C), jnp.float32),
        "w_fc_proj": 0.02 * jax.random.normal(keys[6], (4 * C, C), jnp.float32),
        "b_fc_proj": 0.01 * jax.random.normal(keys[7], (1, C), jnp.float32),
    }

    x = jax.random.normal(jax.random.PRNGKey(42), (B, T, C), jnp.float32)

    ref = jax.block_until_ready(reference_block(x, params))
    out = jax.block_until_ready(minigpt_block(x, params))

    # bf16 MXU operands in the kernel vs. f32 reference -> loose tolerance
    np.testing.assert_allclose(np.asarray(out), np.asarray(ref), rtol=2e-2, atol=2e-2)
    print("KERNEL_OK")
</pallas_src>

<mosaic_0001>
module attributes {stable_mosaic.version = 11 : i64} {
  func.func @block_kernel(%arg0: memref<32x64xf32, #tpu.memory_space<vmem>>, %arg1: memref<1x64xf32, #tpu.memory_space<vmem>>, %arg2: memref<1x64xf32, #tpu.memory_space<vmem>>, %arg3: memref<64x192xbf16, #tpu.memory_space<vmem>>, %arg4: memref<1x192xf32, #tpu.memory_space<vmem>>, %arg5: memref<64x64xbf16, #tpu.memory_space<vmem>>, %arg6: memref<1x64xf32, #tpu.memory_space<vmem>>, %arg7: memref<1x64xf32, #tpu.memory_space<vmem>>, %arg8: memref<1x64xf32, #tpu.memory_space<vmem>>, %arg9: memref<64x256xbf16, #tpu.memory_space<vmem>>, %arg10: memref<1x256xf32, #tpu.memory_space<vmem>>, %arg11: memref<256x64xbf16, #tpu.memory_space<vmem>>, %arg12: memref<1x64xf32, #tpu.memory_space<vmem>>, %arg13: memref<32x64xf32, #tpu.memory_space<vmem>>) attributes {dimension_semantics = [], scalar_prefetch = 0 : i64, scratch_operands = 0 : i64, tpu.core_type = #tpu.core_type<tc>} {
    %c0 = arith.constant 0 : index
    %c0_0 = arith.constant 0 : index
    %0 = vector.load %arg0[%c0, %c0_0] : memref<32x64xf32, #tpu.memory_space<vmem>>, vector<32x64xf32>
    %c0_1 = arith.constant 0 : index
    %c0_2 = arith.constant 0 : index
    %1 = vector.load %arg1[%c0_1, %c0_2] : memref<1x64xf32, #tpu.memory_space<vmem>>, vector<1x64xf32>
    %c0_3 = arith.constant 0 : index
    %c0_4 = arith.constant 0 : index
    %2 = vector.load %arg2[%c0_3, %c0_4] : memref<1x64xf32, #tpu.memory_space<vmem>>, vector<1x64xf32>
    %cst = arith.constant dense<0.000000e+00> : vector<32xf32>
    %3 = vector.multi_reduction <add>, %0, %cst [1] : vector<32x64xf32> to vector<32xf32>
    %4 = vector.shape_cast %3 : vector<32xf32> to vector<32x1xf32>
    %cst_5 = arith.constant 6.400000e+01 : f32
    %5 = vector.broadcast %cst_5 : f32 to vector<32x1xf32>
    %6 = arith.divf %4, %5 : vector<32x1xf32>
    %7 = vector.broadcast %6 : vector<32x1xf32> to vector<32x64xf32>
    %8 = arith.subf %0, %7 : vector<32x64xf32>
    %9 = arith.mulf %8, %8 : vector<32x64xf32>
    %cst_6 = arith.constant dense<0.000000e+00> : vector<32xf32>
    %10 = vector.multi_reduction <add>, %9, %cst_6 [1] : vector<32x64xf32> to vector<32xf32>
    %11 = vector.shape_cast %10 : vector<32xf32> to vector<32x1xf32>
    %cst_7 = arith.constant 6.400000e+01 : f32
    %12 = vector.broadcast %cst_7 : f32 to vector<32x1xf32>
    %13 = arith.divf %11, %12 : vector<32x1xf32>
    %14 = vector.broadcast %6 : vector<32x1xf32> to vector<32x64xf32>
    %15 = arith.subf %0, %14 : vector<32x64xf32>
    %cst_8 = arith.constant 9.99999974E-6 : f32
    %16 = vector.broadcast %cst_8 : f32 to vector<32x1xf32>
    %17 = arith.addf %13, %16 : vector<32x1xf32>
    %18 = math.rsqrt %17 : vector<32x1xf32>
    %19 = vector.broadcast %18 : vector<32x1xf32> to vector<32x64xf32>
    %20 = arith.mulf %15, %19 : vector<32x64xf32>
    %21 = vector.broadcast %1 : vector<1x64xf32> to vector<32x64xf32>
    %22 = arith.mulf %20, %21 : vector<32x64xf32>
    %23 = vector.broadcast %2 : vector<1x64xf32> to vector<32x64xf32>
    %24 = arith.addf %22, %23 : vector<32x64xf32>
    %25 = arith.truncf %24 : vector<32x64xf32> to vector<32x64xbf16>
    %c0_9 = arith.constant 0 : index
    %c0_10 = arith.constant 0 : index
    %26 = vector.load %arg3[%c0_9, %c0_10] : memref<64x192xbf16, #tpu.memory_space<vmem>>, vector<64x192xbf16>
    %cst_11 = arith.constant dense<0.000000e+00> : vector<32x192xf32>
    %27 = tpu.matmul %25, %26, %cst_11 {dimension_numbers = #tpu.dot_dimension_numbers<[1], [0], [0], [1], [0, 0, 1, 1], [], []>} : vector<32x64xbf16>, vector<64x192xbf16>, vector<32x192xf32> -> vector<32x192xf32>
    %c0_12 = arith.constant 0 : index
    %c0_13 = arith.constant 0 : index
    %28 = vector.load %arg4[%c0_12, %c0_13] : memref<1x192xf32, #tpu.memory_space<vmem>>, vector<1x192xf32>
    %29 = vector.broadcast %28 : vector<1x192xf32> to vector<32x192xf32>
    %30 = arith.addf %27, %29 : vector<32x192xf32>
    %31 = vector.extract_strided_slice %30 {offsets = [0, 0], sizes = [16, 16], strides = [1, 1]} : vector<32x192xf32> to vector<16x16xf32>
    %32 = vector.shape_cast %31 : vector<16x16xf32> to vector<1x16x16xf32>
    %33 = vector.extract_strided_slice %30 {offsets = [0, 16], sizes = [16, 16], strides = [1, 1]} : vector<32x192xf32> to vector<16x16xf32>
    %34 = vector.shape_cast %33 : vector<16x16xf32> to vector<1x16x16xf32>
    %35 = vector.extract_strided_slice %30 {offsets = [0, 32], sizes = [16, 16], strides = [1, 1]} : vector<32x192xf32> to vector<16x16xf32>
    %36 = vector.shape_cast %35 : vector<16x16xf32> to vector<1x16x16xf32>
    %37 = vector.extract_strided_slice %30 {offsets = [0, 48], sizes = [16, 16], strides = [1, 1]} : vector<32x192xf32> to vector<16x16xf32>
    %38 = vector.shape_cast %37 : vector<16x16xf32> to vector<1x16x16xf32>
    %39 = vector.extract_strided_slice %30 {offsets = [16, 0], sizes = [16, 16], strides = [1, 1]} : vector<32x192xf32> to vector<16x16xf32>
    %40 = vector.shape_cast %39 : vector<16x16xf32> to vector<1x16x16xf32>
    %41 = vector.extract_strided_slice %30 {offsets = [16, 16], sizes = [16, 16], strides = [1, 1]} : vector<32x192xf32> to vector<16x16xf32>
    %42 = vector.shape_cast %41 : vector<16x16xf32> to vector<1x16x16xf32>
    %43 = vector.extract_strided_slice %30 {offsets = [16, 32], sizes = [16, 16], strides = [1, 1]} : vector<32x192xf32> to vector<16x16xf32>
    %44 = vector.shape_cast %43 : vector<16x16xf32> to vector<1x16x16xf32>
    %45 = vector.extract_strided_slice %30 {offsets = [16, 48], sizes = [16, 16], strides = [1, 1]} : vector<32x192xf32> to vector<16x16xf32>
    %46 = vector.shape_cast %45 : vector<16x16xf32> to vector<1x16x16xf32>
    %47 = tpu.concatenate %32, %34, %36, %38, %40, %42, %44, %46 in 0 : vector<1x16x16xf32>, vector<1x16x16xf32>, vector<1x16x16xf32>, vector<1x16x16xf32>, vector<1x16x16xf32>, vector<1x16x16xf32>, vector<1x16x16xf32>, vector<1x16x16xf32> -> vector<8x16x16xf32>
    %48 = arith.truncf %47 : vector<8x16x16xf32> to vector<8x16x16xbf16>
    %49 = vector.extract_strided_slice %30 {offsets = [0, 64], sizes = [16, 16], strides = [1, 1]} : vector<32x192xf32> to vector<16x16xf32>
    %50 = vector.shape_cast %49 : vector<16x16xf32> to vector<1x16x16xf32>
    %51 = vector.extract_strided_slice %30 {offsets = [0, 80], sizes = [16, 16], strides = [1, 1]} : vector<32x192xf32> to vector<16x16xf32>
    %52 = vector.shape_cast %51 : vector<16x16xf32> to vector<1x16x16xf32>
    %53 = vector.extract_strided_slice %30 {offsets = [0, 96], sizes = [16, 16], strides = [1, 1]} : vector<32x192xf32> to vector<16x16xf32>
    %54 = vector.shape_cast %53 : vector<16x16xf32> to vector<1x16x16xf32>
    %55 = vector.extract_strided_slice %30 {offsets = [0, 112], sizes = [16, 16], strides = [1, 1]} : vector<32x192xf32> to vector<16x16xf32>
    %56 = vector.shape_cast %55 : vector<16x16xf32> to vector<1x16x16xf32>
    %57 = vector.extract_strided_slice %30 {offsets = [16, 64], sizes = [16, 16], strides = [1, 1]} : vector<32x192xf32> to vector<16x16xf32>
    %58 = vector.shape_cast %57 : vector<16x16xf32> to vector<1x16x16xf32>
    %59 = vector.extract_strided_slice %30 {offsets = [16, 80], sizes = [16, 16], strides = [1, 1]} : vector<32x192xf32> to vector<16x16xf32>
    %60 = vector.shape_cast %59 : vector<16x16xf32> to vector<1x16x16xf32>
    %61 = vector.extract_strided_slice %30 {offsets = [16, 96], sizes = [16, 16], strides = [1, 1]} : vector<32x192xf32> to vector<16x16xf32>
    %62 = vector.shape_cast %61 : vector<16x16xf32> to vector<1x16x16xf32>
    %63 = vector.extract_strided_slice %30 {offsets = [16, 112], sizes = [16, 16], strides = [1, 1]} : vector<32x192xf32> to vector<16x16xf32>
    %64 = vector.shape_cast %63 : vector<16x16xf32> to vector<1x16x16xf32>
    %65 = tpu.concatenate %50, %52, %54, %56, %58, %60, %62, %64 in 0 : vector<1x16x16xf32>, vector<1x16x16xf32>, vector<1x16x16xf32>, vector<1x16x16xf32>, vector<1x16x16xf32>, vector<1x16x16xf32>, vector<1x16x16xf32>, vector<1x16x16xf32> -> vector<8x16x16xf32>
    %66 = arith.truncf %65 : vector<8x16x16xf32> to vector<8x16x16xbf16>
    %67 = vector.extract_strided_slice %30 {offsets = [0, 128], sizes = [16, 16], strides = [1, 1]} : vector<32x192xf32> to vector<16x16xf32>
    %68 = vector.shape_cast %67 : vector<16x16xf32> to vector<1x16x16xf32>
    %69 = vector.extract_strided_slice %30 {offsets = [0, 144], sizes = [16, 16], strides = [1, 1]} : vector<32x192xf32> to vector<16x16xf32>
    %70 = vector.shape_cast %69 : vector<16x16xf32> to vector<1x16x16xf32>
    %71 = vector.extract_strided_slice %30 {offsets = [0, 160], sizes = [16, 16], strides = [1, 1]} : vector<32x192xf32> to vector<16x16xf32>
    %72 = vector.shape_cast %71 : vector<16x16xf32> to vector<1x16x16xf32>
    %73 = vector.extract_strided_slice %30 {offsets = [0, 176], sizes = [16, 16], strides = [1, 1]} : vector<32x192xf32> to vector<16x16xf32>
    %74 = vector.shape_cast %73 : vector<16x16xf32> to vector<1x16x16xf32>
    %75 = vector.extract_strided_slice %30 {offsets = [16, 128], sizes = [16, 16], strides = [1, 1]} : vector<32x192xf32> to vector<16x16xf32>
    %76 = vector.shape_cast %75 : vector<16x16xf32> to vector<1x16x16xf32>
    %77 = vector.extract_strided_slice %30 {offsets = [16, 144], sizes = [16, 16], strides = [1, 1]} : vector<32x192xf32> to vector<16x16xf32>
    %78 = vector.shape_cast %77 : vector<16x16xf32> to vector<1x16x16xf32>
    %79 = vector.extract_strided_slice %30 {offsets = [16, 160], sizes = [16, 16], strides = [1, 1]} : vector<32x192xf32> to vector<16x16xf32>
    %80 = vector.shape_cast %79 : vector<16x16xf32> to vector<1x16x16xf32>
    %81 = vector.extract_strided_slice %30 {offsets = [16, 176], sizes = [16, 16], strides = [1, 1]} : vector<32x192xf32> to vector<16x16xf32>
    %82 = vector.shape_cast %81 : vector<16x16xf32> to vector<1x16x16xf32>
    %83 = tpu.concatenate %68, %70, %72, %74, %76, %78, %80, %82 in 0 : vector<1x16x16xf32>, vector<1x16x16xf32>, vector<1x16x16xf32>, vector<1x16x16xf32>, vector<1x16x16xf32>, vector<1x16x16xf32>, vector<1x16x16xf32>, vector<1x16x16xf32> -> vector<8x16x16xf32>
    %84 = arith.truncf %83 : vector<8x16x16xf32> to vector<8x16x16xbf16>
    "tpu.trace_start"() <{level = 10 : i32, message = "bqd,bkd->bqk"}> : () -> ()
    %cst_14 = arith.constant dense<0.000000e+00> : vector<8x16x16xf32>
    %85 = tpu.matmul %48, %66, %cst_14 {dimension_numbers = #tpu.dot_dimension_numbers<[2], [2], [1], [1], [0, 0, 0, 1, 1, 1], [0], [0]>} : vector<8x16x16xbf16>, vector<8x16x16xbf16>, vector<8x16x16xf32> -> vector<8x16x16xf32>
    "tpu.trace_stop"() : () -> ()
    %86 = tpu.iota {dimensions = array<i32: 0>} : vector<16x16xi32>
    %87 = tpu.iota {dimensions = array<i32: 1>} : vector<16x16xi32>
    %88 = arith.cmpi sge, %86, %87 : vector<16x16xi32>
    %cst_15 = arith.constant 0.000000e+00 : f32
    %cst_16 = arith.constant -1.000000e+30 : f32
    %89 = vector.broadcast %cst_15 : f32 to vector<16x16xf32>
    %90 = vector.broadcast %cst_16 : f32 to vector<16x16xf32>
    %91 = arith.select %88, %89, %90 : vector<16x16xi1>, vector<16x16xf32>
    %92 = vector.shape_cast %91 : vector<16x16xf32> to vector<1x16x16xf32>
    %93 = vector.broadcast %92 : vector<1x16x16xf32> to vector<8x16x16xf32>
    %94 = arith.addf %85, %93 : vector<8x16x16xf32>
    %cst_17 = arith.constant dense<0xFF800000> : vector<8x16xf32>
    %95 = vector.multi_reduction <maximumf>, %94, %cst_17 [2] : vector<8x16x16xf32> to vector<8x16xf32>
    %96 = vector.shape_cast %95 : vector<8x16xf32> to vector<8x16x1xf32>
    %97 = vector.broadcast %96 : vector<8x16x1xf32> to vector<8x16x16xf32>
    %98 = arith.subf %94, %97 : vector<8x16x16xf32>
    %99 = math.exp %98 : vector<8x16x16xf32>
    %cst_18 = arith.constant dense<0.000000e+00> : vector<8x16xf32>
    %100 = vector.multi_reduction <add>, %99, %cst_18 [2] : vector<8x16x16xf32> to vector<8x16xf32>
    %101 = vector.shape_cast %100 : vector<8x16xf32> to vector<8x16x1xf32>
    %102 = vector.broadcast %101 : vector<8x16x1xf32> to vector<8x16x16xf32>
    %103 = arith.divf %99, %102 : vector<8x16x16xf32>
    %104 = arith.truncf %103 : vector<8x16x16xf32> to vector<8x16x16xbf16>
    "tpu.trace_start"() <{level = 10 : i32, message = "bqk,bkd->bqd"}> : () -> ()
    %cst_19 = arith.constant dense<0.000000e+00> : vector<8x16x16xf32>
    %105 = tpu.matmul %104, %84, %cst_19 {dimension_numbers = #tpu.dot_dimension_numbers<[2], [1], [1], [2], [0, 0, 0, 1, 1, 2], [0], [0]>} : vector<8x16x16xbf16>, vector<8x16x16xbf16>, vector<8x16x16xf32> -> vector<8x16x16xf32>
    "tpu.trace_stop"() : () -> ()
    %106 = vector.extract_strided_slice %105 {offsets = [0, 0, 0], sizes = [1, 16, 16], strides = [1, 1, 1]} : vector<8x16x16xf32> to vector<1x16x16xf32>
    %107 = vector.shape_cast %106 : vector<1x16x16xf32> to vector<16x16xf32>
    %108 = vector.extract_strided_slice %105 {offsets = [1, 0, 0], sizes = [1, 16, 16], strides = [1, 1, 1]} : vector<8x16x16xf32> to vector<1x16x16xf32>
    %109 = vector.shape_cast %108 : vector<1x16x16xf32> to vector<16x16xf32>
    %110 = vector.extract_strided_slice %105 {offsets = [2, 0, 0], sizes = [1, 16, 16], strides = [1, 1, 1]} : vector<8x16x16xf32> to vector<1x16x16xf32>
    %111 = vector.shape_cast %110 : vector<1x16x16xf32> to vector<16x16xf32>
    %112 = vector.extract_strided_slice %105 {offsets = [3, 0, 0], sizes = [1, 16, 16], strides = [1, 1, 1]} : vector<8x16x16xf32> to vector<1x16x16xf32>
    %113 = vector.shape_cast %112 : vector<1x16x16xf32> to vector<16x16xf32>
    %114 = tpu.concatenate %107, %109, %111, %113 in 1 : vector<16x16xf32>, vector<16x16xf32>, vector<16x16xf32>, vector<16x16xf32> -> vector<16x64xf32>
    %115 = vector.extract_strided_slice %105 {offsets = [4, 0, 0], sizes = [1, 16, 16], strides = [1, 1, 1]} : vector<8x16x16xf32> to vector<1x16x16xf32>
    %116 = vector.shape_cast %115 : vector<1x16x16xf32> to vector<16x16xf32>
    %117 = vector.extract_strided_slice %105 {offsets = [5, 0, 0], sizes = [1, 16, 16], strides = [1, 1, 1]} : vector<8x16x16xf32> to vector<1x16x16xf32>
    %118 = vector.shape_cast %117 : vector<1x16x16xf32> to vector<16x16xf32>
    %119 = vector.extract_strided_slice %105 {offsets = [6, 0, 0], sizes = [1, 16, 16], strides = [1, 1, 1]} : vector<8x16x16xf32> to vector<1x16x16xf32>
    %120 = vector.shape_cast %119 : vector<1x16x16xf32> to vector<16x16xf32>
    %121 = vector.extract_strided_slice %105 {offsets = [7, 0, 0], sizes = [1, 16, 16], strides = [1, 1, 1]} : vector<8x16x16xf32> to vector<1x16x16xf32>
    %122 = vector.shape_cast %121 : vector<1x16x16xf32> to vector<16x16xf32>
    %123 = tpu.concatenate %116, %118, %120, %122 in 1 : vector<16x16xf32>, vector<16x16xf32>, vector<16x16xf32>, vector<16x16xf32> -> vector<16x64xf32>
    %124 = tpu.concatenate %114, %123 in 0 : vector<16x64xf32>, vector<16x64xf32> -> vector<32x64xf32>
    %125 = arith.truncf %124 : vector<32x64xf32> to vector<32x64xbf16>
    %c0_20 = arith.constant 0 : index
    %c0_21 = arith.constant 0 : index
    %126 = vector.load %arg5[%c0_20, %c0_21] : memref<64x64xbf16, #tpu.memory_space<vmem>>, vector<64x64xbf16>
    %cst_22 = arith.constant dense<0.000000e+00> : vector<32x64xf32>
    %127 = tpu.matmul %125, %126, %cst_22 {dimension_numbers = #tpu.dot_dimension_numbers<[1], [0], [0], [1], [0, 0, 1, 1], [], []>} : vector<32x64xbf16>, vector<64x64xbf16>, vector<32x64xf32> -> vector<32x64xf32>
    %c0_23 = arith.constant 0 : index
    %c0_24 = arith.constant 0 : index
    %128 = vector.load %arg6[%c0_23, %c0_24] : memref<1x64xf32, #tpu.memory_space<vmem>>, vector<1x64xf32>
    %129 = vector.broadcast %128 : vector<1x64xf32> to vector<32x64xf32>
    %130 = arith.addf %127, %129 : vector<32x64xf32>
    %131 = arith.addf %0, %130 : vector<32x64xf32>
    %c0_25 = arith.constant 0 : index
    %c0_26 = arith.constant 0 : index
    %132 = vector.load %arg7[%c0_25, %c0_26] : memref<1x64xf32, #tpu.memory_space<vmem>>, vector<1x64xf32>
    %c0_27 = arith.constant 0 : index
    %c0_28 = arith.constant 0 : index
    %133 = vector.load %arg8[%c0_27, %c0_28] : memref<1x64xf32, #tpu.memory_space<vmem>>, vector<1x64xf32>
    %cst_29 = arith.constant dense<0.000000e+00> : vector<32xf32>
    %134 = vector.multi_reduction <add>, %131, %cst_29 [1] : vector<32x64xf32> to vector<32xf32>
    %135 = vector.shape_cast %134 : vector<32xf32> to vector<32x1xf32>
    %cst_30 = arith.constant 6.400000e+01 : f32
    %136 = vector.broadcast %cst_30 : f32 to vector<32x1xf32>
    %137 = arith.divf %135, %136 : vector<32x1xf32>
    %138 = vector.broadcast %137 : vector<32x1xf32> to vector<32x64xf32>
    %139 = arith.subf %131, %138 : vector<32x64xf32>
    %140 = arith.mulf %139, %139 : vector<32x64xf32>
    %cst_31 = arith.constant dense<0.000000e+00> : vector<32xf32>
    %141 = vector.multi_reduction <add>, %140, %cst_31 [1] : vector<32x64xf32> to vector<32xf32>
    %142 = vector.shape_cast %141 : vector<32xf32> to vector<32x1xf32>
    %cst_32 = arith.constant 6.400000e+01 : f32
    %143 = vector.broadcast %cst_32 : f32 to vector<32x1xf32>
    %144 = arith.divf %142, %143 : vector<32x1xf32>
    %145 = vector.broadcast %137 : vector<32x1xf32> to vector<32x64xf32>
    %146 = arith.subf %131, %145 : vector<32x64xf32>
    %cst_33 = arith.constant 9.99999974E-6 : f32
    %147 = vector.broadcast %cst_33 : f32 to vector<32x1xf32>
    %148 = arith.addf %144, %147 : vector<32x1xf32>
    %149 = math.rsqrt %148 : vector<32x1xf32>
    %150 = vector.broadcast %149 : vector<32x1xf32> to vector<32x64xf32>
    %151 = arith.mulf %146, %150 : vector<32x64xf32>
    %152 = vector.broadcast %132 : vector<1x64xf32> to vector<32x64xf32>
    %153 = arith.mulf %151, %152 : vector<32x64xf32>
    %154 = vector.broadcast %133 : vector<1x64xf32> to vector<32x64xf32>
    %155 = arith.addf %153, %154 : vector<32x64xf32>
    %156 = arith.truncf %155 : vector<32x64xf32> to vector<32x64xbf16>
    %c0_34 = arith.constant 0 : index
    %c0_35 = arith.constant 0 : index
    %157 = vector.load %arg9[%c0_34, %c0_35] : memref<64x256xbf16, #tpu.memory_space<vmem>>, vector<64x256xbf16>
    %cst_36 = arith.constant dense<0.000000e+00> : vector<32x256xf32>
    %158 = tpu.matmul %156, %157, %cst_36 {dimension_numbers = #tpu.dot_dimension_numbers<[1], [0], [0], [1], [0, 0, 1, 1], [], []>} : vector<32x64xbf16>, vector<64x256xbf16>, vector<32x256xf32> -> vector<32x256xf32>
    %c0_37 = arith.constant 0 : index
    %c0_38 = arith.constant 0 : index
    %159 = vector.load %arg10[%c0_37, %c0_38] : memref<1x256xf32, #tpu.memory_space<vmem>>, vector<1x256xf32>
    %160 = vector.broadcast %159 : vector<1x256xf32> to vector<32x256xf32>
    %161 = arith.addf %158, %160 : vector<32x256xf32>
    %cst_39 = arith.constant 5.000000e-01 : f32
    %162 = vector.broadcast %cst_39 : f32 to vector<32x256xf32>
    %163 = arith.mulf %162, %161 : vector<32x256xf32>
    %cst_40 = arith.constant 4.471500e-02 : f32
    %164 = vector.broadcast %cst_40 : f32 to vector<32x256xf32>
    %165 = arith.mulf %164, %161 : vector<32x256xf32>
    %166 = arith.mulf %165, %161 : vector<32x256xf32>
    %167 = arith.mulf %166, %161 : vector<32x256xf32>
    %168 = arith.addf %161, %167 : vector<32x256xf32>
    %cst_41 = arith.constant 0.797884583 : f32
    %169 = vector.broadcast %cst_41 : f32 to vector<32x256xf32>
    %170 = arith.mulf %169, %168 : vector<32x256xf32>
    %171 = math.tanh %170 : vector<32x256xf32>
    %cst_42 = arith.constant 1.000000e+00 : f32
    %172 = vector.broadcast %cst_42 : f32 to vector<32x256xf32>
    %173 = arith.addf %172, %171 : vector<32x256xf32>
    %174 = arith.mulf %163, %173 : vector<32x256xf32>
    %175 = arith.truncf %174 : vector<32x256xf32> to vector<32x256xbf16>
    %c0_43 = arith.constant 0 : index
    %c0_44 = arith.constant 0 : index
    %176 = vector.load %arg11[%c0_43, %c0_44] : memref<256x64xbf16, #tpu.memory_space<vmem>>, vector<256x64xbf16>
    %cst_45 = arith.constant dense<0.000000e+00> : vector<32x64xf32>
    %177 = tpu.matmul %175, %176, %cst_45 {dimension_numbers = #tpu.dot_dimension_numbers<[1], [0], [0], [1], [0, 0, 1, 1], [], []>} : vector<32x256xbf16>, vector<256x64xbf16>, vector<32x64xf32> -> vector<32x64xf32>
    %c0_46 = arith.constant 0 : index
    %c0_47 = arith.constant 0 : index
    %178 = vector.load %arg12[%c0_46, %c0_47] : memref<1x64xf32, #tpu.memory_space<vmem>>, vector<1x64xf32>
    %179 = vector.broadcast %178 : vector<1x64xf32> to vector<32x64xf32>
    %180 = arith.addf %177, %179 : vector<32x64xf32>
    %181 = arith.addf %131, %180 : vector<32x64xf32>
    %c0_48 = arith.constant 0 : index
    %c0_49 = arith.constant 0 : index
    %182 = vector.load %arg13[%c0_48, %c0_49] : memref<32x64xf32, #tpu.memory_space<vmem>>, vector<32x64xf32>
    tpu.vector_store %arg13[%c0_48, %c0_49], %181 {strides = array<i32>} : memref<32x64xf32, #tpu.memory_space<vmem>>, vector<32x64xf32>,
    return
  }
}

</mosaic_0001>

<bundles_post_ra>
// kernel: mul.9
= control target key start
LH: loop header
LB: loop body
LE: loop exit
PB: predicated region body
PF: predicated region fallthrough
CT: control target
= control target key end

     0   :  { %3 = vsyncpa [#allocation1], 0  ;;  %s58_s9 = smov [#allocation0]   ;;  %s98_s0 = inlined_call_operand.hbm [shape: f32[1,192], index: 0, kind: input, shape index: {}]   ;;  %s99_s1 = inlined_call_operand.vmem [shape: f32[1,192], index: 1, kind: input, shape index: {}]   ;;  %s100_s2 = inlined_call_operand.vmem [shape: f32[1,192], index: 2, kind: output, shape index: {}]  }
   0x1   :  { %s8_s10 = sshll.u32 %s58_s9, 4  ;;  %s34_s13 = scalar_lea.hbm %s98_s0, 32  ;;  %s9_s10 = int_to_ptr.vmem [resolvable:$true] %s8_s10 }
   0x2   :  { %p35_p0 = scmp.ne.s32.totalorder %s98_s0, %s34_s13  ;;  %p38_p1 = scmp.lt.u32.totalorder %s34_s13, %s98_s0 }
   0x4   :  { %p40_p2 = pnand %p38_p1, %p35_p0 }
   0x6   :  { %43 = shalt.err (!%p40_p2)
}
   0x7   :  { %s44_s18 = scalar_lea.vmem %s9_s10, 32  ;;  %p49_p4 = scmp.lt.s32.totalorder %s9_s10, %s9_s10 }
   0x8   :  { %p45_p3 = scmp.ne.s32.totalorder %s9_s10, %s44_s18  ;;  %p50_p5 = scmp.lt.s32.totalorder %s44_s18, %s44_s18 }
   0xa   :  { %p51_p6 = por %p50_p5, %p49_p4 }
   0xc   :  { %p52_p7 = pnand %p51_p6, %p45_p3 }
   0xe   :  { %55 = shalt.err (!%p52_p7)
}
   0xf   :  { %11 = dma.hbm_to_vmem [thread:$0]  %s98_s0, 32, %s9_s10, [#allocation1]  }
  0x10   :  { %56 = dma.done.wait [#allocation1], 32  }
  0x11   :  { %57 = vsyncadd [#allocation1], 4294967264  ;;  %v13_v0 = vld [vmem:[#allocation0] sm:$0x1]  ;;  %v21_v2 = vld [vmem:[#allocation0 + $0x1] sm:$0x1] }
  0x12   :  { %v14_v1 = vld [vmem:[%s99_s1] sm:$0x1]  ;;  %v31_v4 = vld [vmem:[%s99_s1 + $0x1] sm:$0x1] }
  0x13   :  { %v17_v3 = vmul.f32 %v14_v1, %v13_v0  ;;  %v26_v5 = vmul.f32 %v31_v4, %v21_v2 }
  0x15   :  { %19 = vst [vmem:[%s100_s2] sm:$0x1] %v17_v3  ;;  %32 = vst [vmem:[%s100_s2 + $0x1] sm:$0x1] %v26_v5 }
  0x16   :  { %30 = vsyncpa [#allocation1], 1 }

// kernel: minigpt_block.1
= control target key start
LH: loop header
LB: loop body
LE: loop exit
PB: predicated region body
PF: predicated region fallthrough
CT: control target
= control target key end

     0   :  { %vm51_vm0 = vcmask 523264   ;;  %v2400_v36 = vmov 0   ;;  %s2402_s18 = smov 112   ;;  %s2404_s19 = smov 80   ;;  %vm2405_vm1 = vmmov 0   ;;  %vm354_vm2 = vcmask 130048   ;;  %s3094_s0 = inlined_call_operand.vmem [shape: f32[32,64], index: 0, kind: input, shape index: {}, may-alias: {0,13}]   ;;  %s3095_s3 = inlined_call_operand.vmem [shape: bf16[64,192], index: 3, kind: input, shape index: {}]   ;;  %s3096_s1 = inlined_call_operand.vmem [shape: f32[1,64], index: 1, kind: input, shape index: {}]   ;;  %s3097_s2 = inlined_call_operand.vmem [shape: f32[1,64], index: 2, kind: input, shape index: {}]   ;;  %s3098_s4 = inlined_call_operand.vmem [shape: f32[1,192], index: 4, kind: input, shape index: {}]   ;;  %s3099_s5 = inlined_call_operand.vmem [shape: bf16[64,64], index: 5, kind: input, shape index: {}]   ;;  %s3100_s6 = inlined_call_operand.vmem [shape: f32[1,64], index: 6, kind: input, shape index: {}]   ;;  %s3101_s9 = inlined_call_operand.vmem [shape: bf16[64,256], index: 9, kind: input, shape index: {}]   ;;  %s3102_s7 = inlined_call_operand.vmem [shape: f32[1,64], index: 7, kind: input, shape index: {}]   ;;  %s3103_s8 = inlined_call_operand.vmem [shape: f32[1,64], index: 8, kind: input, shape index: {}]   ;;  %s3104_s11 = inlined_call_operand.vmem [shape: bf16[256,64], index: 11, kind: input, shape index: {}]   ;;  %s3105_s10 = inlined_call_operand.vmem [shape: f32[1,256], index: 10, kind: input, shape index: {}]   ;;  %s3106_s12 = inlined_call_operand.vmem [shape: f32[1,64], index: 12, kind: input, shape index: {}]   ;;  %s3107_s13 = inlined_call_operand.vmem [shape: f32[32,64], index: 13, kind: output, shape index: {}, may-alias: {0,13}]  }
   0x1   :  { %v45_v0 = vld [vmem:[%s3094_s0] sm:$0xff]  ;;  %v47_v1 = vld [vmem:[%s3094_s0 + $0x10] sm:$0xff]  ;;  %v46_v2 = vld [vmem:[%s3094_s0 + $0x8] sm:$0xff]  ;;  %225 = vmatprep.mubr.bf16.mxu0 %v2400_v36  ;;  %s2406_s20 = smov 64   ;;  %s2408_s21 = smov 16   ;;  %vm1314_vm5 = vcmask 261120  }
   0x2   :  { %v52_v3 = vsel %vm51_vm0, %v45_v0, 0.0  ;;  %v58_v4 = vsel %vm51_vm0, %v47_v1, 0.0  ;;  %v48_v5 = vld [vmem:[%s3094_s0 + $0x18] sm:$0xff]  ;;  %v55_v6 = vsel %vm51_vm0, %v46_v2, 0.0  ;;  %v2256_v28 = vld [vmem:[%s3095_s3 + $0x4] ss:$8 sps:$4 sm:$0xff]  }
   0x3   :  { %53 = vadd.xlane.f32.xlu0 %v52_v3  ;;  %59 = vadd.xlane.f32.xlu1 %v58_v4  ;;  %v61_v7 = vsel %vm51_vm0, %v48_v5, 0.0  ;;  %v2258_v29 = vld [vmem:[%s3095_s3] ss:$8 sps:$4 sm:$0xff]   ;;  %v2259_v30 = vld [vmem:[%s3095_s3 + $0x14] ss:$8 sps:$4 sm:$0xff]   ;;  %s2409_s26 = smov 32  }
   0x4   :  { %193 = vmatprep.subr.bf16.mxu0 %v2256_v28  ;;  %v2261_v31 = vld [vmem:[%s3095_s3 + $0x10] ss:$8 sps:$4 sm:$0xff]   ;;  %v2262_v32 = vld [vmem:[%s3095_s3 + $0x24] ss:$8 sps:$4 sm:$0xff]   ;;  %v2264_v33 = vld [vmem:[%s3095_s3 + $0x20] ss:$8 sps:$4 sm:$0xff]  }
   0x5   :  { %194 = vmatpush1.bf16.msra.mxu0 %v2258_v29  ;;  %v2265_v34 = vld [vmem:[%s3095_s3 + $0x34] ss:$8 sps:$4 sm:$0xff]   ;;  %v2267_v35 = vld [vmem:[%s3095_s3 + $0x30] ss:$8 sps:$4 sm:$0xff]   ;;  %v1917_v51 = vld [vmem:[%s3096_s1] ss:$0 sm:$0xff] }
   0x6   :  { %195 = vmatprep.subr.bf16.mxu0 %v2259_v30  ;;  %v1918_v56 = vld [vmem:[%s3097_s2] ss:$0 sm:$0xff]  ;;  %s2410_s27 = smov 48   ;;  %vm1317_vm6 = vcmask 392192  }
   0x7   :  { %56 = vadd.xlane.f32.xlu0 %v55_v6  ;;  %62 = vadd.xlane.f32.xlu1 %v61_v7 }
   0x9   :  { %196 = vmatpush1.bf16.msra.mxu0 %v2261_v31 }
   0xa   :  { %197 = vmatprep.subr.bf16.mxu0 %v2262_v32 }
   0xd   :  { %198 = vmatpush1.bf16.msra.mxu0 %v2264_v33 }
   0xe   :  { %199 = vmatprep.subr.bf16.mxu0 %v2265_v34 }
  0x11   :  { %200 = vmatpush1.bf16.msra.mxu0 %v2267_v35 }
  0x90   :  { %v54_v8 = vpop.xlane.xlu0 %53  ;;  %v60_v9 = vpop.xlane.xlu1 %59 }
  0x91   :  { %v65_v10 = vmul.f32 0.015625, %v54_v8  ;;  %v67_v11 = vmul.f32 0.015625, %v60_v9  ;;  %v135_v8 = vld [vmem:[%s3098_s4] sm:$0x3]  ;;  %s2401_s4 = smov 96  }
  0x93   :  { %v69_v12 = vsub.f32 %v45_v0, %v65_v10  ;;  %v2497_v13 = vsub.f32 %v47_v1, %v67_v11 }
  0x94   :  { %v57_v14 = vpop.xlane.xlu0 %56  ;;  %v63_v15 = vpop.xlane.xlu1 %62 }
  0x95   :  { %v66_v16 = vmul.f32 0.015625, %v57_v14  ;;  %v68_v17 = vmul.f32 0.015625, %v63_v15  ;;  %v73_v18 = vmul.f32 %v69_v12, %v69_v12  ;;  %v75_v19 = vmul.f32 %v2497_v13, %v2497_v13 }
  0x97   :  { %v70_v20 = vsub.f32 %v46_v2, %v66_v16  ;;  %v72_v21 = vsub.f32 %v48_v5, %v68_v17  ;;  %v77_v22 = vsel %vm51_vm0, %v73_v18, 0.0  ;;  %v83_v23 = vsel %vm51_vm0, %v75_v19, 0.0 }
  0x98   :  { %78 = vadd.xlane.f32.xlu0 %v77_v22  ;;  %v137_v5 = vlaneseq }
  0x99   :  { %v74_v24 = vmul.f32 %v70_v20, %v70_v20  ;;  %v76_v25 = vmul.f32 %v72_v21, %v72_v21 }
  0x9a   :  { %v2541_v6 = vshrl.u32 %v137_v5, 7 }
  0x9b   :  { %v80_v26 = vsel %vm51_vm0, %v74_v24, 0.0  ;;  %v86_v27 = vsel %vm51_vm0, %v76_v25, 0.0  ;;  %v2403_v25 = vmov 0.0  }
  0x9c   :  { %84 = vadd.xlane.f32.xlu0 %v83_v23  ;;  %81 = vadd.xlane.f32.xlu1 %v80_v26  ;;  %v139_v7 = vsub.s32 0, %v2541_v6  ;;  %v143_v9 = vsub.s32 1, %v2541_v6 }
  0x9d   :  { %2047 = vmatprep.subr.bf16.mxu0 %v2403_v25  ;;  %2053 = vmatprep.subr.bf16.mxu1 %v2403_v25 }
  0x9e   :  { %v140_v10 = vrot.slane %v135_v8, %v139_v7  ;;  %2055 = vmatprep.mubr.msk.bf16.mxu1 %vm2405_vm1, %v2403_v25 }
  0xa0   :  { %87 = vadd.xlane.f32.xlu1 %v86_v27 }
 0x125   :  { %v79_v37 = vpop.xlane.xlu0 %78 }
 0x126   :  { %v89_v38 = vmul.f32 0.015625, %v79_v37 }
 0x128   :  { %v93_v39 = vadd.f32 1e-05, %v89_v38 }
 0x129   :  { %v82_v40 = vpop.xlane.xlu1 %81  ;;  %v85_v41 = vpop.xlane.xlu0 %84 }
 0x12a   :  { %2300 = vrsqrt.f32 %v93_v39  ;;  %v90_v42 = vmul.f32 0.015625, %v82_v40  ;;  %v91_v43 = vmul.f32 0.015625, %v85_v41 }
 0x12c   :  { %v94_v44 = vadd.f32 1e-05, %v90_v42  ;;  %v95_v45 = vadd.f32 1e-05, %v91_v43 }
 0x12d   :  { %v88_v46 = vpop.xlane.xlu1 %87 }
 0x12e   :  { %2302 = vrsqrt.f32 %v94_v44  ;;  %v92_v47 = vmul.f32 0.015625, %v88_v46 }
 0x12f   :  { %2304 = vrsqrt.f32 %v95_v45 }
 0x130   :  { %v96_v48 = vadd.f32 1e-05, %v92_v47 }
 0x132   :  { %2306 = vrsqrt.f32 %v96_v48 }
 0x134   :  { %v2301_v49 = vpop.eup %2300 }
 0x135   :  { %v101_v50 = vmul.f32 %v2301_v49, %v69_v12  ;;  %v144_v12 = vrot.slane %v135_v8, %v143_v9 }
 0x137   :  { %v111_v54 = vmul.f32 %v1917_v51, %v101_v50 }
 0x138   :  { %v2303_v52 = vpop.eup %2302 }
 0x139   :  { %v102_v53 = vmul.f32 %v2303_v52, %v70_v20  ;;  %v2305_v55 = vpop.eup %2304  ;;  %v121_v61 = vadd.f32 %v1918_v56, %v111_v54 }
 0x13a   :  { %v103_v59 = vmul.f32 %v2305_v55, %v2497_v13 }
 0x13b   :  { %v112_v57 = vmul.f32 %v1917_v51, %v102_v53 }
 0x13c   :  { %v2307_v58 = vpop.eup %2306  ;;  %v113_v1 = vmul.f32 %v1917_v51, %v103_v59 }
 0x13d   :  { %v104_v60 = vmul.f32 %v2307_v58, %v72_v21  ;;  %v122_v62 = vadd.f32 %v1918_v56, %v112_v57 }
 0x13e   :  { %v123_v3 = vadd.f32 %v1918_v56, %v113_v1 }
 0x13f   :  { %v125_v63 = vpack.c.bf16 %v122_v62, %v121_v61  ;;  %v114_v0 = vmul.f32 %v1917_v51, %v104_v60 }
 0x141   :  { %1927 = vmatmul.mubr.msk.bf16.vlgmr.msra.gmra.mrb[0].mxu0 %vm51_vm0, %v125_v63  ;;  %v124_v2 = vadd.f32 %v1918_v56, %v114_v0 }
 0x142   :  { %235 = vmatprep.mubr.bf16.mxu0 %v2400_v36 }
 0x143   :  { %v126_v4 = vpack.c.bf16 %v124_v2, %v123_v3 }
 0x149   :  { %1928 = vmatmul.mubr.msk.bf16.gmra.mrb[4].mxu0 %vm51_vm0, %v126_v4 }
 0x14a   :  { %2049 = vmatprep.mubr.msk.bf16.mxu0 %vm2405_vm1, %v2403_v25 }
 0x214   :  { %v227_v11 = vpop.f32.mrb[0].mxu0 }
 0x215   :  { %v229_v13 = vpop.f32.mrb[1].mxu0  ;;  %v228_v15 = vadd.f32 %v227_v11, %v140_v10 }
 0x216   :  { %v231_v14 = vpop.f32.mrb[2].mxu0  ;;  %v2552_v18 = vadd.f32 %v229_v13, %v144_v12 }
 0x217   :  { %v232_v16 = vadd.f32 %v231_v14, %v140_v10  ;;  %v233_v17 = vpop.f32.mrb[3].mxu0 }
 0x218   :  { %v2554_v19 = vadd.f32 %v233_v17, %v144_v12 }
 0x219   :  { %v2171_v20 = vpack.i.bf16 %v232_v16, %v228_v15  ;;  %v2556_v21 = vpack.c.bf16 %v232_v16, %v228_v15 }
 0x21a   :  { %v334_v22 = vpack.c.bf16 %v2554_v19, %v2552_v18  ;;  %v2562_v23 = vpack.i.bf16 %v2554_v19, %v2552_v18 }
 0x21b   :  { %2172 = vrot.lane.b32.xlu1 %v2171_v20, %s2401_s4  ;;  %2167 = vrot.lane.b32.xlu0 %v2171_v20, %s2402_s18 }
 0x21c   :  { %v237_v24 = vpop.f32.mrb[4].mxu0 }
 0x21d   :  { %v239_v26 = vpop.f32.mrb[5].mxu0  ;;  %v238_v29 = vadd.f32 %v237_v24, %v140_v10  ;;  %v2407_v24 = vmov -1e+30  }
 0x21e   :  { %v2568_v27 = vadd.f32 %v239_v26, %v144_v12  ;;  %v241_v28 = vpop.f32.mrb[6].mxu0 }
 0x21f   :  { %v242_v30 = vadd.f32 %v241_v28, %v140_v10  ;;  %2177 = vrot.lane.b32.xlu1 %v2171_v20, %s2404_s19  ;;  %v243_v31 = vpop.f32.mrb[7].mxu0  ;;  %v346_v20 = vand.u32 127, %v137_v5 }
 0x220   :  { %v2573_v32 = vadd.f32 %v243_v31, %v144_v12 }
 0x221   :  { %v2186_v33 = vpack.i.bf16 %v242_v30, %v238_v29  ;;  %v2577_v34 = vpack.c.bf16 %v242_v30, %v238_v29  ;;  %vm347_vm3 = vcmp.ge.s32.totalorder %v2541_v6, %v346_v20 }
 0x222   :  { %v2581_v35 = vpack.i.bf16 %v2573_v32, %v2568_v27  ;;  %v338_v37 = vpack.c.bf16 %v2573_v32, %v2568_v27  ;;  %v2647_v26 = vsel %vm347_vm3, 0.0, %v2407_v24 }
 0x223   :  { %2187 = vrot.lane.b32.xlu0 %v2186_v33, %s2401_s4  ;;  %2182 = vrot.lane.b32.xlu1 %v2186_v33, %s2402_s18 }
 0x227   :  { %352 = vrot.lane.b32.xlu0 %v2556_v21, %s2406_s20  ;;  %2192 = vrot.lane.b32.xlu1 %v2186_v33, %s2404_s19 }
 0x28d   :  { %v2173_v38 = vpop.permute.xlu1 %2172  ;;  %v2168_v39 = vpop.permute.xlu0 %2167 }
 0x28e   :  { %v2175_v40 = vunpack.i.h.bf16 %v2173_v38  ;;  %v2174_v41 = vunpack.i.l.bf16 %v2173_v38  ;;  %v2170_v42 = vunpack.i.h.bf16 %v2168_v39  ;;  %v2169_v43 = vunpack.i.l.bf16 %v2168_v39 }
 0x290   :  { %v288_v44 = vpack.c.bf16 %v2175_v40, %v2174_v41  ;;  %v287_v45 = vpack.c.bf16 %v2170_v42, %v2169_v43 }
 0x291   :  { %v2178_v46 = vpop.permute.xlu1 %2177 }
 0x292   :  { %v2180_v47 = vunpack.i.h.bf16 %v2178_v46  ;;  %v2179_v48 = vunpack.i.l.bf16 %v2178_v46  ;;  %453 = vrot.lane.b32.xlu0 %v288_v44, %s2406_s20  ;;  %403 = vrot.lane.b32.xlu1 %v287_v45, %s2406_s20 }
 0x294   :  { %v289_v49 = vpack.c.bf16 %v2180_v47, %v2179_v48 }
 0x295   :  { %v2183_v50 = vpop.permute.xlu1 %2182  ;;  %v2188_v51 = vpop.permute.xlu0 %2187 }
 0x296   :  { %v2185_v52 = vunpack.i.h.bf16 %v2183_v50  ;;  %v2184_v53 = vunpack.i.l.bf16 %v2183_v50  ;;  %v2190_v54 = vunpack.i.h.bf16 %v2188_v51  ;;  %v2189_v55 = vunpack.i.l.bf16 %v2188_v51  ;;  %553 = vrot.lane.b32.xlu0 %v2577_v34, %s2406_s20  ;;  %503 = vrot.lane.b32.xlu1 %v289_v49, %s2406_s20 }
 0x298   :  { %v291_v56 = vpack.c.bf16 %v2185_v52, %v2184_v53  ;;  %v292_v57 = vpack.c.bf16 %v2190_v54, %v2189_v55 }
 0x299   :  { %v2193_v58 = vpop.permute.xlu1 %2192  ;;  %v353_v59 = vpop.permute.xlu0 %352 }
 0x29a   :  { %v2195_v60 = vunpack.i.h.bf16 %v2193_v58  ;;  %v2194_v61 = vunpack.i.l.bf16 %v2193_v58  ;;  %v359_v62 = vsel %vm354_vm2, %v353_v59, 0  ;;  %653 = vrot.lane.b32.xlu0 %v292_v57, %s2406_s20  ;;  %603 = vrot.lane.b32.xlu1 %v291_v56, %s2406_s20 }
 0x29b   :  { %2048 = vmatpush3.bf16.xpose.msra.mxu0 %v359_v62 }
 0x29c   :  { %v293_v63 = vpack.c.bf16 %v2195_v60, %v2194_v61  ;;  %2065 = vmatprep.subr.bf16.mxu0 %v2403_v25 }
 0x29e   :  { %703 = vrot.lane.b32.xlu1 %v293_v63, %s2406_s20 }
 0x2a2   :  { %2050 = vmatmul.mubr.msk.bf16.vlgmr.msra.gmra.mrb[8].mxu0 %vm354_vm2, %v2556_v21  ;;  %v344_v21 = vadd.s32 8, %v2541_v6 }
 0x2a3   :  { %2067 = vmatprep.mubr.msk.bf16.mxu0 %vm2405_vm1, %v2403_v25 }
 0x2a4   :  { %vm348_vm4 = vcmp.ge.s32.totalorder %v344_v21, %v346_v20 }
 0x2a5   :  { %v2649_v29 = vsel %vm348_vm4, 0.0, %v2407_v24 }
 0x304   :  { %v404_v0 = vpop.permute.xlu1 %403  ;;  %v454_v4 = vpop.permute.xlu0 %453 }
 0x305   :  { %v409_v1 = vsel %vm354_vm2, %v404_v0, 0  ;;  %v459_v8 = vsel %vm354_vm2, %v454_v4, 0 }
 0x306   :  { %2054 = vmatpush3.bf16.xpose.msra.mxu1 %v409_v1 }
 0x307   :  { %2059 = vmatprep.subr.bf16.mxu1 %v2403_v25 }
 0x308   :  { %v504_v2 = vpop.permute.xlu1 %503  ;;  %v554_v12 = vpop.permute.xlu0 %553 }
 0x309   :  { %v509_v3 = vsel %vm354_vm2, %v504_v2, 0  ;;  %v559_v13 = vsel %vm354_vm2, %v554_v12, 0 }
 0x30a   :  { %2066 = vmatpush3.bf16.xpose.msra.mxu0 %v509_v3 }
 0x30b   :  { %2077 = vmatprep.subr.bf16.mxu0 %v2403_v25 }
 0x30c   :  { %v604_v10 = vpop.permute.xlu1 %603  ;;  %v654_v16 = vpop.permute.xlu0 %653 }
 0x30d   :  { %2056 = vmatmul.mubr.msk.bf16.vlgmr.msra.gmra.mrb[0].mxu1 %vm354_vm2, %v287_v45  ;;  %v609_v11 = vsel %vm354_vm2, %v604_v10, 0  ;;  %v659_v17 = vsel %vm354_vm2, %v654_v16, 0 }
 0x30e   :  { %2060 = vmatpush3.bf16.xpose.msra.mxu1 %v459_v8  ;;  %2061 = vmatprep.mubr.msk.bf16.mxu1 %vm2405_vm1, %v2403_v25 }
 0x30f   :  { %2071 = vmatprep.subr.bf16.mxu1 %v2403_v25 }
 0x310   :  { %v704_v14 = vpop.permute.xlu1 %703 }
 0x311   :  { %2068 = vmatmul.mubr.msk.bf16.vlgmr.msra.gmra.mrb[12].mxu0 %vm354_vm2, %v289_v49  ;;  %v709_v15 = vsel %vm354_vm2, %v704_v14, 0 }
 0x312   :  { %2078 = vmatpush3.bf16.xpose.msra.mxu0 %v609_v11  ;;  %2079 = vmatprep.mubr.msk.bf16.mxu0 %vm2405_vm1, %v2403_v25 }
 0x313   :  { %2089 = vmatprep.subr.bf16.mxu0 %v2403_v25 }
 0x315   :  { %2062 = vmatmul.mubr.msk.bf16.vlgmr.msra.gmra.mrb[4].mxu1 %vm354_vm2, %v288_v44 }
 0x316   :  { %2072 = vmatpush3.bf16.xpose.msra.mxu1 %v559_v13  ;;  %2073 = vmatprep.mubr.msk.bf16.mxu1 %vm2405_vm1, %v2403_v25 }
 0x317   :  { %2083 = vmatprep.subr.bf16.mxu1 %v2403_v25 }
 0x319   :  { %2080 = vmatmul.mubr.msk.bf16.vlgmr.msra.gmra.mrb[16].mxu0 %vm354_vm2, %v291_v56 }
 0x31a   :  { %2090 = vmatpush3.bf16.xpose.msra.mxu0 %v709_v15  ;;  %2091 = vmatprep.mubr.msk.bf16.mxu0 %vm2405_vm1, %v2403_v25 }
 0x31b   :  { %2101 = vmatprep.subr.bf16.mxu0 %v2403_v25 }
 0x31d   :  { %2074 = vmatmul.mubr.msk.bf16.vlgmr.msra.gmra.mrb[8].mxu1 %vm354_vm2, %v2577_v34 }
 0x31e   :  { %2084 = vmatpush3.bf16.xpose.msra.mxu1 %v659_v17  ;;  %2085 = vmatprep.mubr.msk.bf16.mxu1 %vm2405_vm1, %v2403_v25 }
 0x31f   :  { %2095 = vmatprep.subr.bf16.mxu1 %v2403_v25 }
 0x321   :  { %2092 = vmatmul.mubr.msk.bf16.vlgmr.msra.gmra.mrb[20].mxu0 %vm354_vm2, %v293_v63 }
 0x322   :  { %2103 = vmatprep.mubr.msk.bf16.mxu0 %vm2405_vm1, %v2403_v25 }
 0x325   :  { %2086 = vmatmul.mubr.msk.bf16.vlgmr.msra.gmra.mrb[12].mxu1 %vm354_vm2, %v292_v57 }
 0x326   :  { %2096 = vmatpush3.bf16.msra.mxu1 %v334_v22  ;;  %2097 = vmatprep.mubr.msk.bf16.mxu1 %vm2405_vm1, %v2403_v25 }
 0x327   :  { %2107 = vmatprep.subr.bf16.mxu1 %v2403_v25 }
 0x375   :  { %v395_v28 = vpop.f32.mrb[8].mxu0 }
 0x376   :  { %v2652_v18 = vadd.f32 %v395_v28, %v2647_v26  ;;  %v2051_v19 = vpop.f32.mrb[9].mxu0 }
 0x377   :  { %v398_v22 = vpop.f32.mrb[10].mxu0 }
 0x378   :  { %v2655_v30 = vadd.f32 %v398_v22, %v2649_v29  ;;  %v2052_v5 = vpop.f32.mrb[11].mxu0  ;;  %v752_v31 = vsel %vm354_vm2, %v2652_v18, -inf }
 0x379   :  { %753 = vmax.xlane.f32.xlu0 %v752_v31 }
 0x37a   :  { %v755_v33 = vsel %vm354_vm2, %v2655_v30, -inf }
 0x37b   :  { %756 = vmax.xlane.f32.xlu1 %v755_v33 }
 0x3e0   :  { %v445_v34 = vpop.f32.mrb[0].mxu1 }
 0x3e1   :  { %v2662_v38 = vadd.f32 %v445_v34, %v2647_v26  ;;  %v2057_v39 = vpop.f32.mrb[1].mxu1 }
 0x3e2   :  { %v448_v40 = vpop.f32.mrb[2].mxu1 }
 0x3e3   :  { %v2665_v41 = vadd.f32 %v448_v40, %v2649_v29  ;;  %v2058_v42 = vpop.f32.mrb[3].mxu1  ;;  %v758_v43 = vsel %vm354_vm2, %v2662_v38, -inf }
 0x3e4   :  { %759 = vmax.xlane.f32.xlu0 %v758_v43  ;;  %v545_v44 = vpop.f32.mrb[12].mxu0 }
 0x3e5   :  { %v2069_v45 = vpop.f32.mrb[13].mxu0  ;;  %v2670_v47 = vadd.f32 %v545_v44, %v2647_v26  ;;  %v761_v50 = vsel %vm354_vm2, %v2665_v41, -inf }
 0x3e6   :  { %v548_v46 = vpop.f32.mrb[14].mxu0 }
 0x3e7   :  { %v2673_v48 = vadd.f32 %v548_v46, %v2649_v29  ;;  %v2070_v49 = vpop.f32.mrb[15].mxu0  ;;  %v770_v58 = vsel %vm354_vm2, %v2670_v47, -inf }
 0x3e8   :  { %762 = vmax.xlane.f32.xlu0 %v761_v50  ;;  %v495_v51 = vpop.f32.mrb[4].mxu1 }
 0x3e9   :  { %v2063_v52 = vpop.f32.mrb[5].mxu1  ;;  %v773_v53 = vsel %vm354_vm2, %v2673_v48, -inf  ;;  %v2680_v55 = vadd.f32 %v495_v51, %v2647_v26 }
 0x3ea   :  { %v498_v54 = vpop.f32.mrb[6].mxu1  ;;  %774 = vmax.xlane.f32.xlu1 %v773_v53 }
 0x3eb   :  { %v2683_v56 = vadd.f32 %v498_v54, %v2649_v29  ;;  %v2064_v57 = vpop.f32.mrb[7].mxu1  ;;  %v764_v2 = vsel %vm354_vm2, %v2680_v55, -inf }
 0x3ec   :  { %771 = vmax.xlane.f32.xlu0 %v770_v58  ;;  %v645_v59 = vpop.f32.mrb[16].mxu0 }
 0x3ed   :  { %v2081_v60 = vpop.f32.mrb[17].mxu0  ;;  %v767_v61 = vsel %vm354_vm2, %v2683_v56, -inf  ;;  %v2690_v63 = vadd.f32 %v645_v59, %v2647_v26 }
 0x3ee   :  { %768 = vmax.xlane.f32.xlu1 %v767_v61  ;;  %v648_v62 = vpop.f32.mrb[18].mxu0 }
 0x3ef   :  { %v2693_v0 = vadd.f32 %v648_v62, %v2649_v29  ;;  %v2082_v1 = vpop.f32.mrb[19].mxu0  ;;  %v782_v14 = vsel %vm354_vm2, %v2690_v63, -inf }
 0x3f0   :  { %v595_v3 = vpop.f32.mrb[8].mxu1  ;;  %765 = vmax.xlane.f32.xlu0 %v764_v2 }
 0x3f1   :  { %v2075_v4 = vpop.f32.mrb[9].mxu1  ;;  %v785_v8 = vsel %vm354_vm2, %v2693_v0, -inf  ;;  %v2700_v11 = vadd.f32 %v595_v3, %v2647_v26 }
 0x3f2   :  { %v598_v10 = vpop.f32.mrb[10].mxu1  ;;  %786 = vmax.xlane.f32.xlu1 %v785_v8 }
 0x3f3   :  { %v2703_v12 = vadd.f32 %v598_v10, %v2649_v29  ;;  %v2076_v13 = vpop.f32.mrb[11].mxu1  ;;  %v776_v19 = vsel %vm354_vm2, %v2700_v11, -inf }
 0x3f4   :  { %783 = vmax.xlane.f32.xlu0 %v782_v14  ;;  %v745_v15 = vpop.f32.mrb[20].mxu0 }
 0x3f5   :  { %v2093_v16 = vpop.f32.mrb[21].mxu0  ;;  %v779_v17 = vsel %vm354_vm2, %v2703_v12, -inf  ;;  %v2710_v21 = vadd.f32 %v745_v15, %v2647_v26 }
 0x3f6   :  { %780 = vmax.xlane.f32.xlu1 %v779_v17  ;;  %v748_v20 = vpop.f32.mrb[22].mxu0 }
 0x3f7   :  { %v2713_v24 = vadd.f32 %v748_v20, %v2649_v29  ;;  %v2094_v28 = vpop.f32.mrb[23].mxu0  ;;  %v794_v40 = vsel %vm354_vm2, %v2710_v21, -inf }
 0x3f8   :  { %v695_v22 = vpop.f32.mrb[12].mxu1  ;;  %777 = vmax.xlane.f32.xlu0 %v776_v19 }
 0x3f9   :  { %v2087_v5 = vpop.f32.mrb[13].mxu1  ;;  %v797_v31 = vsel %vm354_vm2, %v2713_v24, -inf  ;;  %v2720_v34 = vadd.f32 %v695_v22, %v2647_v26 }
 0x3fa   :  { %v698_v33 = vpop.f32.mrb[14].mxu1  ;;  %798 = vmax.xlane.f32.xlu1 %v797_v31 }
 0x3fb   :  { %v2088_v39 = vpop.f32.mrb[15].mxu1  ;;  %v788_v42 = vsel %vm354_vm2, %v2720_v34, -inf  ;;  %v2734_v45 = vadd.f32 %v698_v33, %v2649_v29 }
 0x3fc   :  { %795 = vmax.xlane.f32.xlu0 %v794_v40 }
 0x3fd   :  { %v791_v46 = vsel %vm354_vm2, %v2734_v45, -inf }
 0x400   :  { %789 = vmax.xlane.f32.xlu0 %v788_v42 }
 0x406   :  { %v754_v26 = vpop.xlane.xlu0 %753 }
 0x407   :  { %v800_v43 = vsub.f32 %v2652_v18, %v754_v26 }
 0x409   :  { %v816_v44 = vmul.f32 1.442695, %v800_v43 }
 0x40b   :  { %2202 = vrot.lane.b32.xlu1 %v2562_v23, %s2401_s4  ;;  %2308 = vpow2.f32 %v816_v44 }
 0x415   :  { %v2738_v49 = vpop.eup %2308 }
 0x416   :  { %2197 = vrot.lane.b32.xlu0 %v2562_v23, %s2402_s18  ;;  %v848_v50 = vsel %vm354_vm2, %v2738_v49, 0.0 }
 0x41a   :  { %2207 = vrot.lane.b32.xlu0 %v2562_v23, %s2404_s19  ;;  %v757_v23 = vpop.xlane.xlu1 %756 }
 0x41b   :  { %v801_v18 = vsub.f32 %v2655_v30, %v757_v23 }
 0x41d   :  { %v818_v51 = vmul.f32 1.442695, %v801_v18 }
 0x41f   :  { %2310 = vpow2.f32 %v818_v51 }
 0x429   :  { %v2745_v29 = vpop.eup %2310 }
 0x42a   :  { %v851_v52 = vsel %vm354_vm2, %v2745_v29, 0.0 }
 0x42f   :  { %792 = vmax.xlane.f32.xlu1 %v791_v46 }
 0x439   :  { %849 = vadd.xlane.f32.xlu0 %v848_v50 }
 0x440   :  { %2212 = vrot.lane.b32.xlu1 %v2581_v35, %s2402_s18 }
 0x464   :  { %852 = vadd.xlane.f32.xlu1 %v851_v52 }
 0x471   :  { %v760_v53 = vpop.xlane.xlu0 %759 }
 0x472   :  { %v802_v54 = vsub.f32 %v2662_v38, %v760_v53 }
 0x474   :  { %v820_v57 = vmul.f32 1.442695, %v802_v54 }
 0x475   :  { %v763_v58 = vpop.xlane.xlu0 %762 }
 0x476   :  { %2312 = vpow2.f32 %v820_v57  ;;  %v803_v59 = vsub.f32 %v2665_v41, %v763_v58 }
 0x477   :  { %v775_v60 = vpop.xlane.xlu1 %774 }
 0x478   :  { %v822_v61 = vmul.f32 1.442695, %v803_v59  ;;  %v807_v30 = vsub.f32 %v2673_v48, %v775_v60 }
 0x479   :  { %v772_v62 = vpop.xlane.xlu0 %771 }
 0x47a   :  { %2314 = vpow2.f32 %v822_v61  ;;  %v830_v1 = vmul.f32 1.442695, %v807_v30  ;;  %v806_v2 = vsub.f32 %v2670_v47, %v772_v62 }
 0x47b   :  { %v769_v3 = vpop.xlane.xlu1 %768 }
 0x47c   :  { %2316 = vpow2.f32 %v830_v1  ;;  %v828_v4 = vmul.f32 1.442695, %v806_v2  ;;  %v805_v8 = vsub.f32 %v2683_v56, %v769_v3 }
 0x47d   :  { %v766_v38 = vpop.xlane.xlu0 %765 }
 0x47e   :  { %2318 = vpow2.f32 %v828_v4  ;;  %v826_v10 = vmul.f32 1.442695, %v805_v8  ;;  %v804_v13 = vsub.f32 %v2680_v55, %v766_v38 }
 0x47f   :  { %v787_v41 = vpop.xlane.xlu1 %786 }
 0x480   :  { %v2755_v14 = vpop.eup %2312  ;;  %2320 = vpow2.f32 %v826_v10  ;;  %v824_v48 = vmul.f32 1.442695, %v804_v13  ;;  %v811_v15 = vsub.f32 %v2693_v0, %v787_v41 }
 0x481   :  { %v784_v16 = vpop.xlane.xlu0 %783  ;;  %v854_v47 = vsel %vm354_vm2, %v2755_v14, 0.0 }
 0x482   :  { %2322 = vpow2.f32 %v824_v48  ;;  %v838_v17 = vmul.f32 1.442695, %v811_v15  ;;  %v810_v56 = vsub.f32 %v2690_v63, %v784_v16  ;;  %855 = vadd.xlane.f32.xlu0 %v854_v47 }
 0x483   :  { %v781_v20 = vpop.xlane.xlu1 %780 }
 0x484   :  { %v2761_v28 = vpop.eup %2314  ;;  %2324 = vpow2.f32 %v838_v17  ;;  %v836_v55 = vmul.f32 1.442695, %v810_v56  ;;  %v809_v63 = vsub.f32 %v2703_v12, %v781_v20 }
 0x485   :  { %v778_v19 = vpop.xlane.xlu0 %777  ;;  %v857_v22 = vsel %vm354_vm2, %v2761_v28, 0.0 }
 0x486   :  { %v2765_v5 = vpop.eup %2316  ;;  %2326 = vpow2.f32 %v836_v55  ;;  %v808_v0 = vsub.f32 %v2700_v11, %v778_v19  ;;  %858 = vadd.xlane.f32.xlu1 %v857_v22  ;;  %v834_v46 = vmul.f32 1.442695, %v809_v63 }
 0x487   :  { %v799_v39 = vpop.xlane.xlu1 %798  ;;  %v869_v26 = vsel %vm354_vm2, %v2765_v5, 0.0 }
 0x488   :  { %v2768_v31 = vpop.eup %2318  ;;  %v832_v33 = vmul.f32 1.442695, %v808_v0  ;;  %v815_v12 = vsub.f32 %v2713_v24, %v799_v39 }
 0x489   :  { %v796_v40 = vpop.xlane.xlu0 %795  ;;  %v866_v42 = vsel %vm354_vm2, %v2768_v31, 0.0 }
 0x48a   :  { %v2775_v43 = vpop.eup %2320  ;;  %2328 = vpow2.f32 %v832_v33  ;;  %v814_v44 = vsub.f32 %v2710_v21, %v796_v40  ;;  %867 = vadd.xlane.f32.xlu0 %v866_v42  ;;  %870 = vadd.xlane.f32.xlu1 %v869_v26  ;;  %v846_v54 = vmul.f32 1.442695, %v815_v12 }
 0x48b   :  { %v863_v51 = vsel %vm354_vm2, %v2775_v43, 0.0  ;;  %v2203_v41 = vpop.permute.xlu1 %2202 }
 0x48c   :  { %v2778_v11 = vpop.eup %2322  ;;  %v844_v50 = vmul.f32 1.442695, %v814_v44  ;;  %v2204_v63 = vunpack.i.l.bf16 %v2203_v41 }
 0x48d   :  { %v790_v23 = vpop.xlane.xlu0 %789  ;;  %v860_v18 = vsel %vm354_vm2, %v2778_v11, 0.0 }
 0x48e   :  { %v2785_v52 = vpop.eup %2324  ;;  %2330 = vpow2.f32 %v844_v50  ;;  %v812_v21 = vsub.f32 %v2720_v34, %v790_v23  ;;  %861 = vadd.xlane.f32.xlu0 %v860_v18  ;;  %864 = vadd.xlane.f32.xlu1 %v863_v51 }
 0x48f   :  { %2332 = vpow2.f32 %v834_v46  ;;  %v881_v59 = vsel %vm354_vm2, %v2785_v52, 0.0 }
 0x490   :  { %v2788_v53 = vpop.eup %2326  ;;  %v840_v24 = vmul.f32 1.442695, %v812_v21 }
 0x491   :  { %v2198_v57 = vpop.permute.xlu0 %2197  ;;  %v878_v58 = vsel %vm354_vm2, %v2788_v53, 0.0 }
 0x492   :  { %2334 = vpow2.f32 %v840_v24  ;;  %v2200_v60 = vunpack.i.h.bf16 %v2198_v57  ;;  %v2199_v61 = vunpack.i.l.bf16 %v2198_v57  ;;  %879 = vadd.xlane.f32.xlu0 %v878_v58  ;;  %882 = vadd.xlane.f32.xlu1 %v881_v59 }
 0x493   :  { %2336 = vpow2.f32 %v846_v54 }
 0x494   :  { %v2794_v34 = vpop.eup %2328  ;;  %v335_v30 = vpack.c.bf16 %v2200_v60, %v2199_v61 }
 0x495   :  { %v872_v62 = vsel %vm354_vm2, %v2794_v34, 0.0  ;;  %v2208_v56 = vpop.permute.xlu0 %2207 }
 0x496   :  { %873 = vadd.xlane.f32.xlu0 %v872_v62  ;;  %2102 = vmatpush3.bf16.msra.mxu0 %v335_v30  ;;  %v2210_v23 = vunpack.i.h.bf16 %v2208_v56  ;;  %v2209_v18 = vunpack.i.l.bf16 %v2208_v56 }
 0x497   :  { %2113 = vmatprep.subr.bf16.mxu0 %v2403_v25 }
 0x498   :  { %v2799_v1 = vpop.eup %2330  ;;  %v337_v59 = vpack.c.bf16 %v2210_v23, %v2209_v18 }
 0x499   :  { %v890_v2 = vsel %vm354_vm2, %v2799_v1, 0.0  ;;  %v2803_v3 = vpop.eup %2332 }
 0x49a   :  { %891 = vadd.xlane.f32.xlu1 %v890_v2  ;;  %v875_v38 = vsel %vm354_vm2, %v2803_v3, 0.0 }
 0x49c   :  { %v2805_v4 = vpop.eup %2334 }
 0x49d   :  { %v884_v8 = vsel %vm354_vm2, %v2805_v4, 0.0  ;;  %v2811_v10 = vpop.eup %2336 }
 0x49e   :  { %885 = vadd.xlane.f32.xlu0 %v884_v8  ;;  %876 = vadd.xlane.f32.xlu1 %v875_v38  ;;  %v893_v13 = vsel %vm354_vm2, %v2811_v10, 0.0 }
 0x4a2   :  { %894 = vadd.xlane.f32.xlu1 %v893_v13 }
 0x4b4   :  { %2217 = vrot.lane.b32.xlu0 %v2581_v35, %s2401_s4 }
 0x4bc   :  { %v793_v48 = vpop.xlane.xlu1 %792 }
 0x4bd   :  { %v813_v15 = vsub.f32 %v2734_v45, %v793_v48  ;;  %v2205_v45 = vunpack.i.h.bf16 %v2203_v41 }
 0x4bf   :  { %v842_v16 = vmul.f32 1.442695, %v813_v15  ;;  %v336_v42 = vpack.c.bf16 %v2205_v45, %v2204_v63 }
 0x4c0   :  { %v2213_v20 = vpop.permute.xlu1 %2212 }
 0x4c1   :  { %2338 = vpow2.f32 %v842_v16  ;;  %v2215_v30 = vunpack.i.h.bf16 %v2213_v20  ;;  %v2214_v62 = vunpack.i.l.bf16 %v2213_v20 }
 0x4c3   :  { %v339_v16 = vpack.c.bf16 %v2215_v30, %v2214_v62  ;;  %v2268_v62 = vld [vmem:[%s3099_s5] sm:$0xff]  }
 0x4c6   :  { %v850_v55 = vpop.xlane.xlu0 %849 }
 0x4c7   :  { %2340 = vrcp.f32 %v850_v55 }
 0x4cb   :  { %v2818_v47 = vpop.eup %2338 }
 0x4cc   :  { %v887_v17 = vsel %vm354_vm2, %v2818_v47, 0.0 }
 0x4cd   :  { %888 = vadd.xlane.f32.xlu1 %v887_v17 }
 0x4d1   :  { %v2341_v22 = vpop.eup %2340 }
 0x4d2   :  { %v897_v33 = vmul.f32 %v2341_v22, %v2738_v49 }
 0x4de   :  { %2222 = vrot.lane.b32.xlu1 %v2581_v35, %s2404_s19 }
 0x4f1   :  { %v853_v19 = vpop.xlane.xlu1 %852 }
 0x4f2   :  { %2342 = vrcp.f32 %v853_v19 }
 0x4fc   :  { %v2343_v0 = vpop.eup %2342 }
 0x4fd   :  { %v899_v39 = vmul.f32 %v2343_v0, %v2745_v29 }
 0x4ff   :  { %v928_v40 = vpack.c.bf16 %v899_v39, %v897_v33 }
 0x501   :  { %2098 = vmatmul.mubr.msk.bf16.vlgmr.msra.gmra.mrb[16].mxu1 %vm354_vm2, %v928_v40 }
 0x502   :  { %2108 = vmatpush3.bf16.msra.mxu1 %v336_v42  ;;  %2109 = vmatprep.mubr.msk.bf16.mxu1 %vm2405_vm1, %v2403_v25 }
 0x503   :  { %2119 = vmatprep.subr.bf16.mxu1 %v2403_v25 }
 0x50f   :  { %v856_v35 = vpop.xlane.xlu0 %855 }
 0x510   :  { %2344 = vrcp.f32 %v856_v35 }
 0x513   :  { %v859_v26 = vpop.xlane.xlu1 %858 }
 0x514   :  { %2346 = vrcp.f32 %v859_v26 }
 0x517   :  { %v868_v44 = vpop.xlane.xlu0 %867  ;;  %v871_v46 = vpop.xlane.xlu1 %870 }
 0x518   :  { %2348 = vrcp.f32 %v868_v44 }
 0x519   :  { %2350 = vrcp.f32 %v871_v46 }
 0x51a   :  { %v2345_v12 = vpop.eup %2344 }
 0x51b   :  { %v862_v49 = vpop.xlane.xlu0 %861  ;;  %v865_v29 = vpop.xlane.xlu1 %864  ;;  %v901_v51 = vmul.f32 %v2345_v12, %v2755_v14 }
 0x51c   :  { %2352 = vrcp.f32 %v862_v49 }
 0x51d   :  { %2354 = vrcp.f32 %v865_v29 }
 0x51e   :  { %v2347_v50 = vpop.eup %2346 }
 0x51f   :  { %v903_v21 = vmul.f32 %v2347_v50, %v2761_v28  ;;  %v880_v54 = vpop.xlane.xlu0 %879  ;;  %v883_v24 = vpop.xlane.xlu1 %882 }
 0x520   :  { %2356 = vrcp.f32 %v880_v54 }
 0x521   :  { %2358 = vrcp.f32 %v883_v24  ;;  %v929_v57 = vpack.c.bf16 %v903_v21, %v901_v51 }
 0x522   :  { %v2349_v58 = vpop.eup %2348 }
 0x523   :  { %v2351_v60 = vpop.eup %2350  ;;  %2104 = vmatmul.mubr.msk.bf16.vlgmr.msra.gmra.mrb[24].mxu0 %vm354_vm2, %v929_v57  ;;  %v909_v61 = vmul.f32 %v2349_v58, %v2768_v31  ;;  %v874_v41 = vpop.xlane.xlu0 %873 }
 0x524   :  { %2114 = vmatpush3.bf16.msra.mxu0 %v337_v59  ;;  %2115 = vmatprep.mubr.msk.bf16.mxu0 %vm2405_vm1, %v2403_v25  ;;  %v911_v14 = vmul.f32 %v2351_v60, %v2765_v5  ;;  %2360 = vrcp.f32 %v874_v41 }
 0x525   :  { %2125 = vmatprep.subr.bf16.mxu0 %v2403_v25 }
 0x526   :  { %v2353_v28 = vpop.eup %2352  ;;  %v931_v48 = vpack.c.bf16 %v911_v14, %v909_v61 }
 0x527   :  { %v2355_v2 = vpop.eup %2354  ;;  %v905_v8 = vmul.f32 %v2353_v28, %v2778_v11  ;;  %v892_v38 = vpop.xlane.xlu1 %891 }
 0x528   :  { %v907_v13 = vmul.f32 %v2355_v2, %v2775_v43  ;;  %v2269_v2 = vld [vmem:[%s3099_s5 + $0x8] sm:$0xff]  }
 0x52a   :  { %v2357_v15 = vpop.eup %2356  ;;  %v930_v17 = vpack.c.bf16 %v907_v13, %v905_v8 }
 0x52b   :  { %v2359_v56 = vpop.eup %2358  ;;  %2116 = vmatmul.mubr.msk.bf16.vlgmr.msra.gmra.mrb[28].mxu0 %vm354_vm2, %v931_v48  ;;  %v877_v5 = vpop.xlane.xlu1 %876  ;;  %v917_v31 = vmul.f32 %v2357_v15, %v2788_v53 }
 0x52c   :  { %2110 = vmatmul.mubr.msk.bf16.vlgmr.msra.gmra.mrb[20].mxu1 %vm354_vm2, %v930_v17  ;;  %2126 = vmatpush3.bf16.msra.mxu0 %v339_v16  ;;  %v919_v11 = vmul.f32 %v2359_v56, %v2785_v52  ;;  %2362 = vrcp.f32 %v877_v5  ;;  %v886_v43 = vpop.xlane.xlu0 %885  ;;  %v2270_v5 = vld [vmem:[%s3099_s5 + $0x10] sm:$0xff]  }
 0x52d   :  { %2120 = vmatpush3.bf16.msra.mxu1 %v338_v37  ;;  %2127 = vmatprep.mubr.msk.bf16.mxu0 %vm2405_vm1, %v2403_v25 }
 0x52e   :  { %2121 = vmatprep.mubr.msk.bf16.mxu1 %vm2405_vm1, %v2403_v25  ;;  %2131 = vmatprep.subr.bf16.mxu1 %v2403_v25  ;;  %v933_v20 = vpack.c.bf16 %v919_v11, %v917_v31  ;;  %v2361_v27 = vpop.eup %2360  ;;  %v2271_v31 = vld [vmem:[%s3099_s5 + $0x18] sm:$0xff]  }
 0x52f   :  { %2137 = vmatprep.subr.bf16.mxu0 %v2403_v25  ;;  %v913_v55 = vmul.f32 %v2361_v27, %v2794_v34  ;;  %v895_v45 = vpop.xlane.xlu1 %894 }
 0x530   :  { %v2218_v52 = vpop.permute.xlu0 %2217  ;;  %2364 = vrcp.f32 %v895_v45 }
 0x531   :  { %v2220_v37 = vunpack.i.h.bf16 %v2218_v52  ;;  %v2219_v53 = vunpack.i.l.bf16 %v2218_v52  ;;  %2366 = vrcp.f32 %v892_v38 }
 0x532   :  { %2368 = vrcp.f32 %v886_v43 }
 0x533   :  { %2128 = vmatmul.mubr.msk.bf16.vlgmr.msra.gmra.mrb[32].mxu0 %vm354_vm2, %v933_v20  ;;  %v340_v0 = vpack.c.bf16 %v2220_v37, %v2219_v53 }
 0x534   :  { %2139 = vmatprep.mubr.msk.bf16.mxu0 %vm2405_vm1, %v2403_v25 }
 0x536   :  { %v2363_v32 = vpop.eup %2362 }
 0x537   :  { %v915_v19 = vmul.f32 %v2363_v32, %v2803_v3 }
 0x539   :  { %v932_v22 = vpack.c.bf16 %v915_v19, %v913_v55 }
 0x53a   :  { %v2365_v33 = vpop.eup %2364 }
 0x53b   :  { %2122 = vmatmul.mubr.msk.bf16.vlgmr.msra.gmra.mrb[24].mxu1 %vm354_vm2, %v932_v22  ;;  %v2367_v40 = vpop.eup %2366  ;;  %v927_v3 = vmul.f32 %v2365_v33, %v2811_v10 }
 0x53c   :  { %2132 = vmatpush3.bf16.msra.mxu1 %v340_v0  ;;  %2133 = vmatprep.mubr.msk.bf16.mxu1 %vm2405_vm1, %v2403_v25  ;;  %v925_v26 = vmul.f32 %v2367_v40, %v2799_v1  ;;  %v2369_v44 = vpop.eup %2368 }
 0x53d   :  { %v921_v49 = vmul.f32 %v2369_v44, %v2805_v4  ;;  %2143 = vmatprep.subr.bf16.mxu1 %v2268_v62 }
 0x53e   :  { %v935_v46 = vpack.c.bf16 %v927_v3, %v925_v26 }
 0x55a   :  { %v889_v63 = vpop.xlane.xlu1 %888 }
 0x55b   :  { %2370 = vrcp.f32 %v889_v63 }
 0x55e   :  { %v2223_v39 = vpop.permute.xlu1 %2222 }
 0x55f   :  { %v2225_v34 = vunpack.i.h.bf16 %v2223_v39  ;;  %v2224_v42 = vunpack.i.l.bf16 %v2223_v39 }
 0x561   :  { %v341_v35 = vpack.c.bf16 %v2225_v34, %v2224_v42 }
 0x563   :  { %2138 = vmatpush3.bf16.msra.mxu0 %v341_v35 }
 0x565   :  { %v2371_v25 = vpop.eup %2370 }
 0x566   :  { %v923_v29 = vmul.f32 %v2371_v25, %v2818_v47  ;;  %2140 = vmatmul.mubr.msk.bf16.vlgmr.msra.gmra.mrb[36].mxu0 %vm354_vm2, %v935_v46 }
 0x567   :  { %1624 = vmatprep.mubr.bf16.mxu0 %v2400_v36 }
 0x568   :  { %v934_v12 = vpack.c.bf16 %v923_v29, %v921_v49 }
 0x56a   :  { %2134 = vmatmul.mubr.msk.bf16.vlgmr.msra.gmra.mrb[28].mxu1 %vm354_vm2, %v934_v12 }
 0x56b   :  { %2144 = vmatpush3.bf16.msra.mxu1 %v2268_v62 }
 0x56c   :  { %2145 = vmatprep.subr.bf16.mxu1 %v2269_v2 }
 0x56f   :  { %2146 = vmatpush3.bf16.msra.mxu1 %v2269_v2 }
 0x570   :  { %2147 = vmatprep.subr.bf16.mxu1 %v2270_v5 }
 0x573   :  { %2148 = vmatpush3.bf16.msra.mxu1 %v2270_v5 }
 0x574   :  { %2149 = vmatprep.subr.bf16.mxu1 %v2271_v31 }
 0x577   :  { %2150 = vmatpush3.bf16.msra.mxu1 %v2271_v31  ;;  %v2399_v31 = vld [vmem:[%s3094_s0 + $0x18] sm:$0xff] }
 0x5d4   :  { %v2868_v50 = vpop.f32.mrb[16].mxu1 }
 0x5d5   :  { %v2099_v10 = vpop.f32.mrb[17].mxu1 }
 0x5d6   :  { %v2870_v23 = vpop.f32.mrb[18].mxu1 }
 0x5d7   :  { %v2100_v1 = vpop.f32.mrb[19].mxu1 }
 0x5f6   :  { %v1017_v18 = vpop.f32.mrb[24].mxu0 }
 0x5f7   :  { %v2105_v51 = vpop.f32.mrb[25].mxu0 }
 0x5f8   :  { %v1020_v21 = vpop.f32.mrb[26].mxu0 }
 0x5f9   :  { %v2226_v54 = vpack.i.bf16 %v1020_v21, %v1017_v18  ;;  %v2106_v4 = vpop.f32.mrb[27].mxu0 }
 0x5fb   :  { %2227 = vrot.lane.b32.xlu0 %v2226_v54, %s2408_s21 }
 0x5fe   :  { %v1105_v47 = vpop.f32.mrb[28].mxu0 }
 0x5ff   :  { %v1061_v24 = vpop.f32.mrb[20].mxu1  ;;  %v2117_v57 = vpop.f32.mrb[29].mxu0 }
 0x600   :  { %v2111_v58 = vpop.f32.mrb[21].mxu1  ;;  %v1108_v59 = vpop.f32.mrb[30].mxu0 }
 0x601   :  { %v1064_v60 = vpop.f32.mrb[22].mxu1  ;;  %v2236_v61 = vpack.i.bf16 %v1108_v59, %v1105_v47  ;;  %v2118_v14 = vpop.f32.mrb[31].mxu0 }
 0x602   :  { %v2231_v28 = vpack.i.bf16 %v1064_v60, %v1061_v24  ;;  %v2112_v30 = vpop.f32.mrb[23].mxu1  ;;  %v1945_v60 = vld [vmem:[%s3100_s6] ss:$0 sm:$0xff] }
 0x604   :  { %2232 = vrot.lane.b32.xlu1 %v2231_v28, %s2409_s26 }
 0x606   :  { %v1193_v8 = vpop.f32.mrb[32].mxu0 }
 0x607   :  { %v2129_v38 = vpop.f32.mrb[33].mxu0 }
 0x608   :  { %2237 = vrot.lane.b32.xlu1 %v2236_v61, %s2410_s27  ;;  %v1196_v13 = vpop.f32.mrb[34].mxu0 }
 0x609   :  { %v2241_v41 = vpack.i.bf16 %v1196_v13, %v1193_v8  ;;  %v2130_v48 = vpop.f32.mrb[35].mxu0  ;;  %v2396_v8 = vld [vmem:[%s3094_s0] sm:$0xff] }
 0x60b   :  { %2242 = vrot.lane.b32.xlu0 %v2241_v41, %s2408_s21  ;;  %v2397_v41 = vld [vmem:[%s3094_s0 + $0x10] sm:$0xff] }
 0x60e   :  { %v1149_v15 = vpop.f32.mrb[24].mxu1 }
 0x60f   :  { %v2123_v16 = vpop.f32.mrb[25].mxu1 }
 0x610   :  { %v1152_v17 = vpop.f32.mrb[26].mxu1  ;;  %v2398_v16 = vld [vmem:[%s3094_s0 + $0x8] sm:$0xff] }
 0x611   :  { %v2124_v56 = vpop.f32.mrb[27].mxu1 }
 0x639   :  { %v1281_v11 = vpop.f32.mrb[36].mxu0 }
 0x63a   :  { %v2141_v43 = vpop.f32.mrb[37].mxu0 }
 0x63b   :  { %v1284_v20 = vpop.f32.mrb[38].mxu0 }
 0x63c   :  { %v2251_v52 = vpack.i.bf16 %v1284_v20, %v1281_v11  ;;  %v2142_v27 = vpop.f32.mrb[39].mxu0 }
 0x63d   :  { %v1237_v32 = vpop.f32.mrb[28].mxu1 }
 0x63e   :  { %2252 = vrot.lane.b32.xlu1 %v2251_v52, %s2410_s27  ;;  %v2135_v37 = vpop.f32.mrb[29].mxu1 }
 0x63f   :  { %v1240_v53 = vpop.f32.mrb[30].mxu1 }
 0x640   :  { %v2246_v55 = vpack.i.bf16 %v1240_v53, %v1237_v32  ;;  %v2136_v19 = vpop.f32.mrb[31].mxu1 }
 0x642   :  { %2247 = vrot.lane.b32.xlu0 %v2246_v55, %s2409_s26 }
 0x66d   :  { %v2228_v22 = vpop.permute.xlu0 %2227 }
 0x66e   :  { %v2230_v45 = vunpack.i.h.bf16 %v2228_v22  ;;  %v2229_v63 = vunpack.i.l.bf16 %v2228_v22 }
 0x670   :  { %v1313_v34 = vsel %vm354_vm2, %v2870_v23, %v2230_v45  ;;  %v1312_v42 = vsel %vm354_vm2, %v2868_v50, %v2229_v63 }
 0x676   :  { %v2233_v0 = vpop.permute.xlu1 %2232 }
 0x677   :  { %v2235_v33 = vunpack.i.h.bf16 %v2233_v0  ;;  %v2234_v39 = vunpack.i.l.bf16 %v2233_v0 }
 0x679   :  { %v1316_v26 = vsel %vm1314_vm5, %v1313_v34, %v2235_v33  ;;  %v1315_v44 = vsel %vm1314_vm5, %v1312_v42, %v2234_v39 }
 0x67a   :  { %v2238_v40 = vpop.permute.xlu1 %2237 }
 0x67b   :  { %v2240_v3 = vunpack.i.h.bf16 %v2238_v40  ;;  %v2239_v35 = vunpack.i.l.bf16 %v2238_v40 }
 0x67d   :  { %v1318_v46 = vsel %vm1317_vm6, %v1315_v44, %v2239_v35  ;;  %v1319_v25 = vsel %vm1317_vm6, %v1316_v26, %v2240_v3  ;;  %v2243_v29 = vpop.permute.xlu0 %2242 }
 0x67e   :  { %v1350_v49 = vpack.c.bf16 %v1319_v25, %v1318_v46  ;;  %v2245_v12 = vunpack.i.h.bf16 %v2243_v29  ;;  %v2244_v10 = vunpack.i.l.bf16 %v2243_v29  ;;  %v2274_v46 = vld [vmem:[%s3101_s9 + $0x4] ss:$8 sps:$4 sm:$0xff]   ;;  %v2272_v25 = vld [vmem:[%s3101_s9] ss:$8 sps:$4 sm:$0xff]   ;;  %v2275_v29 = vld [vmem:[%s3101_s9 + $0x10] ss:$8 sps:$4 sm:$0xff]  }
 0x67f   :  { %1592 = vmatprep.subr.bf16.mxu0 %v2274_v46 }
 0x680   :  { %2151 = vmatprep.mubr.msk.bf16.mxu1 %vm51_vm0, %v1350_v49  ;;  %v1344_v51 = vsel %vm354_vm2, %v1149_v15, %v2244_v10  ;;  %v1345_v21 = vsel %vm354_vm2, %v1152_v17, %v2245_v12  ;;  %1593 = vmatpush1.bf16.msra.mxu0 %v2272_v25  ;;  %v2277_v49 = vld [vmem:[%s3101_s9 + $0x14] ss:$8 sps:$4 sm:$0xff]   ;;  %v2280_v12 = vld [vmem:[%s3101_s9 + $0x24] ss:$8 sps:$4 sm:$0xff]   ;;  %v2278_v10 = vld [vmem:[%s3101_s9 + $0x20] ss:$8 sps:$4 sm:$0xff]  }
 0x681   :  { %1594 = vmatprep.subr.bf16.mxu0 %v2277_v49 }
 0x684   :  { %1595 = vmatpush1.bf16.msra.mxu0 %v2275_v29 }
 0x685   :  { %1596 = vmatprep.subr.bf16.mxu0 %v2280_v12 }
 0x688   :  { %1597 = vmatpush1.bf16.msra.mxu0 %v2278_v10 }
 0x6b0   :  { %v2253_v23 = vpop.permute.xlu1 %2252 }
 0x6b1   :  { %v2255_v54 = vunpack.i.h.bf16 %v2253_v23  ;;  %v2254_v4 = vunpack.i.l.bf16 %v2253_v23  ;;  %v2283_v23 = vld [vmem:[%s3101_s9 + $0x34] ss:$8 sps:$4 sm:$0xff]  }
 0x6b2   :  { %1598 = vmatprep.subr.bf16.mxu0 %v2283_v23 }
 0x6b4   :  { %v2248_v1 = vpop.permute.xlu0 %2247 }
 0x6b5   :  { %v2250_v18 = vunpack.i.h.bf16 %v2248_v1  ;;  %v2249_v50 = vunpack.i.l.bf16 %v2248_v1  ;;  %v2281_v1 = vld [vmem:[%s3101_s9 + $0x30] ss:$8 sps:$4 sm:$0xff]  }
 0x6b6   :  { %1599 = vmatpush1.bf16.msra.mxu0 %v2281_v1 }
 0x6b7   :  { %v1347_v47 = vsel %vm1314_vm5, %v1345_v21, %v2250_v18  ;;  %v1346_v24 = vsel %vm1314_vm5, %v1344_v51, %v2249_v50 }
 0x6b8   :  { %v1349_v57 = vsel %vm1317_vm6, %v1347_v47, %v2255_v54  ;;  %v1348_v58 = vsel %vm1317_vm6, %v1346_v24, %v2254_v4 }
 0x6b9   :  { %v1351_v59 = vpack.c.bf16 %v1349_v57, %v1348_v58 }
 0x6bb   :  { %2152 = vmatmul.mubr.msk.bf16.vlgmr.msra.gmra.mrb[32].mxu1 %vm51_vm0, %v1351_v59 }
 0x78e   :  { %v2153_v61 = vpop.f32.mrb[32].mxu1 }
 0x78f   :  { %v1431_v14 = vpop.f32.mrb[33].mxu1  ;;  %v1440_v28 = vadd.f32 %v2153_v61, %v1945_v60 }
 0x790   :  { %v1432_v30 = vadd.f32 %v1945_v60, %v1431_v14  ;;  %v2154_v62 = vpop.f32.mrb[34].mxu1  ;;  %v1952_v14 = vld [vmem:[%s3102_s7] ss:$0 sm:$0xff] }
 0x791   :  { %v1434_v2 = vpop.f32.mrb[35].mxu1  ;;  %v2913_v48 = vadd.f32 %v2397_v41, %v1440_v28  ;;  %v1443_v15 = vadd.f32 %v2154_v62, %v1945_v60 }
 0x792   :  { %v2908_v38 = vadd.f32 %v2396_v8, %v1432_v30  ;;  %v1435_v13 = vadd.f32 %v1945_v60, %v1434_v2 }
 0x793   :  { %v2927_v11 = vadd.f32 %v2399_v31, %v1443_v15  ;;  %v1458_v43 = vsel %vm51_vm0, %v2913_v48, 0.0 }
 0x794   :  { %v2918_v17 = vadd.f32 %v2398_v16, %v1435_v13  ;;  %v1452_v56 = vsel %vm51_vm0, %v2908_v38, 0.0  ;;  %v1953_v13 = vld [vmem:[%s3103_s8] ss:$0 sm:$0xff] }
 0x795   :  { %1453 = vadd.xlane.f32.xlu0 %v1452_v56  ;;  %v1461_v20 = vsel %vm51_vm0, %v2927_v11, 0.0 }
 0x796   :  { %v1455_v5 = vsel %vm51_vm0, %v2918_v17, 0.0 }
 0x797   :  { %1456 = vadd.xlane.f32.xlu1 %v1455_v5 }
 0x799   :  { %1459 = vadd.xlane.f32.xlu0 %v1458_v43 }
 0x79d   :  { %1462 = vadd.xlane.f32.xlu0 %v1461_v20 }
 0x822   :  { %v1454_v52 = vpop.xlane.xlu0 %1453 }
 0x823   :  { %v1464_v27 = vmul.f32 0.015625, %v1454_v52 }
 0x824   :  { %v1457_v32 = vpop.xlane.xlu1 %1456 }
 0x825   :  { %v1468_v37 = vsub.f32 %v2908_v38, %v1464_v27  ;;  %v1465_v53 = vmul.f32 0.015625, %v1457_v32 }
 0x826   :  { %v1460_v55 = vpop.xlane.xlu0 %1459 }
 0x827   :  { %v1469_v19 = vsub.f32 %v2918_v17, %v1465_v53  ;;  %v1466_v22 = vmul.f32 0.015625, %v1460_v55  ;;  %v1472_v0 = vmul.f32 %v1468_v37, %v1468_v37  ;;  %v2284_v53 = vld [vmem:[%s3104_s11 + $0x40] sm:$0xff]  }
 0x828   :  { %v2285_v55 = vld [vmem:[%s3104_s11] sm:$0xff]   ;;  %2019 = vmatprep.subr.bf16.mxu1 %v2284_v53 }
 0x829   :  { %v1470_v45 = vsub.f32 %v2913_v48, %v1466_v22  ;;  %v1476_v63 = vsel %vm51_vm0, %v1472_v0, 0.0  ;;  %v1473_v33 = vmul.f32 %v1469_v19, %v1469_v19  ;;  %2020 = vmatpush3.bf16.msra.mxu1 %v2285_v55  ;;  %v2288_v22 = vld [vmem:[%s3104_s11 + $0x50] sm:$0xff]  }
 0x82a   :  { %1477 = vadd.xlane.f32.xlu0 %v1476_v63  ;;  %v1463_v39 = vpop.xlane.xlu0 %1462  ;;  %v2289_v0 = vld [vmem:[%s3104_s11 + $0x10] sm:$0xff]   ;;  %v2291_v63 = vld [vmem:[%s3104_s11 + $0x18] sm:$0xff]  }
 0x82b   :  { %v1467_v40 = vmul.f32 0.015625, %v1463_v39  ;;  %v1479_v34 = vsel %vm51_vm0, %v1473_v33, 0.0  ;;  %v1474_v42 = vmul.f32 %v1470_v45, %v1470_v45  ;;  %v2292_v33 = vld [vmem:[%s3104_s11 + $0x60] sm:$0xff]  }
 0x82c   :  { %1480 = vadd.xlane.f32.xlu1 %v1479_v34  ;;  %v2293_v39 = vld [vmem:[%s3104_s11 + $0x20] sm:$0xff]   ;;  %v2295_v34 = vld [vmem:[%s3104_s11 + $0x28] sm:$0xff]  }
 0x82d   :  { %v1471_v3 = vsub.f32 %v2927_v11, %v1467_v40  ;;  %v1482_v35 = vsel %vm51_vm0, %v1474_v42, 0.0  ;;  %v2294_v40 = vld [vmem:[%s3104_s11 + $0x68] sm:$0xff]   ;;  %v2296_v42 = vld [vmem:[%s3104_s11 + $0x70] sm:$0xff]  }
 0x82e   :  { %1483 = vadd.xlane.f32.xlu0 %v1482_v35  ;;  %v2298_v35 = vld [vmem:[%s3104_s11 + $0x78] sm:$0xff]  }
 0x82f   :  { %v1475_v26 = vmul.f32 %v1471_v3, %v1471_v3 }
 0x831   :  { %v1485_v44 = vsel %vm51_vm0, %v1475_v26, 0.0  ;;  %v2299_v26 = vld [vmem:[%s3104_s11 + $0x38] sm:$0xff]  }
 0x832   :  { %1486 = vadd.xlane.f32.xlu1 %v1485_v44  ;;  %v1534_v44 = vld [vmem:[%s3105_s10] sm:$0x3] }
 0x833   :  { %v1539_v46 = vrot.slane %v1534_v44, %v139_v7  ;;  %v1543_v25 = vrot.slane %v1534_v44, %v143_v9 }
 0x8b7   :  { %v1478_v18 = vpop.xlane.xlu0 %1477 }
 0x8b8   :  { %v1488_v50 = vmul.f32 0.015625, %v1478_v18 }
 0x8b9   :  { %v1481_v51 = vpop.xlane.xlu1 %1480 }
 0x8ba   :  { %v1492_v21 = vadd.f32 1e-05, %v1488_v50  ;;  %v1489_v54 = vmul.f32 0.015625, %v1481_v51 }
 0x8bb   :  { %v1484_v4 = vpop.xlane.xlu0 %1483 }
 0x8bc   :  { %2372 = vrsqrt.f32 %v1492_v21  ;;  %v1493_v47 = vadd.f32 1e-05, %v1489_v54  ;;  %v1490_v24 = vmul.f32 0.015625, %v1484_v4 }
 0x8be   :  { %2374 = vrsqrt.f32 %v1493_v47  ;;  %v1494_v57 = vadd.f32 1e-05, %v1490_v24 }
 0x8bf   :  { %v1487_v58 = vpop.xlane.xlu1 %1486 }
 0x8c0   :  { %2376 = vrsqrt.f32 %v1494_v57  ;;  %v1491_v59 = vmul.f32 0.015625, %v1487_v58 }
 0x8c2   :  { %v1495_v60 = vadd.f32 1e-05, %v1491_v59 }
 0x8c4   :  { %2378 = vrsqrt.f32 %v1495_v60 }
 0x8c6   :  { %v2373_v61 = vpop.eup %2372 }
 0x8c7   :  { %v1500_v28 = vmul.f32 %v2373_v61, %v1468_v37 }
 0x8c8   :  { %v2375_v30 = vpop.eup %2374 }
 0x8c9   :  { %v1510_v62 = vmul.f32 %v1952_v14, %v1500_v28  ;;  %v1501_v2 = vmul.f32 %v2375_v30, %v1469_v19  ;;  %v2286_v19 = vld [vmem:[%s3104_s11 + $0x48] sm:$0xff]  }
 0x8ca   :  { %v2377_v8 = vpop.eup %2376  ;;  %2021 = vmatprep.subr.bf16.mxu1 %v2286_v19 }
 0x8cb   :  { %v1511_v41 = vmul.f32 %v1952_v14, %v1501_v2  ;;  %v1502_v15 = vmul.f32 %v2377_v8, %v1470_v45  ;;  %v1520_v16 = vadd.f32 %v1953_v13, %v1510_v62  ;;  %v2290_v45 = vld [vmem:[%s3104_s11 + $0x58] sm:$0xff]  }
 0x8cd   :  { %v1521_v56 = vadd.f32 %v1953_v13, %v1511_v41  ;;  %v1512_v20 = vmul.f32 %v1952_v14, %v1502_v15 }
 0x8ce   :  { %v2379_v5 = vpop.eup %2378 }
 0x8cf   :  { %v1503_v31 = vmul.f32 %v2379_v5, %v1471_v3  ;;  %v1524_v43 = vpack.c.bf16 %v1521_v56, %v1520_v16  ;;  %v1522_v32 = vadd.f32 %v1953_v13, %v1512_v20  ;;  %v2297_v3 = vld [vmem:[%s3104_s11 + $0x30] sm:$0xff]  }
 0x8d1   :  { %1962 = vmatmul.mubr.msk.bf16.vlgmr.msra.gmra.mrb[40].mxu0 %vm51_vm0, %v1524_v43  ;;  %v1513_v52 = vmul.f32 %v1952_v14, %v1503_v31 }
 0x8d2   :  { %1634 = vmatprep.mubr.bf16.mxu0 %v2400_v36  ;;  %v2287_v36 = vld [vmem:[%s3104_s11 + $0x8] sm:$0xff]  }
 0x8d3   :  { %v1523_v27 = vadd.f32 %v1953_v13, %v1513_v52  ;;  %2022 = vmatpush3.bf16.msra.mxu1 %v2287_v36 }
 0x8d4   :  { %2023 = vmatprep.subr.bf16.mxu1 %v2288_v22 }
 0x8d5   :  { %v1525_v37 = vpack.c.bf16 %v1523_v27, %v1522_v32 }
 0x8d7   :  { %2024 = vmatpush3.bf16.msra.mxu1 %v2289_v0 }
 0x8d8   :  { %2025 = vmatprep.subr.bf16.mxu1 %v2290_v45 }
 0x8d9   :  { %1963 = vmatmul.mubr.msk.bf16.gmra.mrb[44].mxu0 %vm51_vm0, %v1525_v37 }
 0x8db   :  { %2026 = vmatpush3.bf16.msra.mxu1 %v2291_v63 }
 0x8dc   :  { %2027 = vmatprep.subr.bf16.mxu1 %v2292_v33 }
 0x8df   :  { %2028 = vmatpush3.bf16.msra.mxu1 %v2293_v39 }
 0x8e0   :  { %2029 = vmatprep.subr.bf16.mxu1 %v2294_v40 }
 0x8e3   :  { %2030 = vmatpush3.bf16.msra.mxu1 %v2295_v34 }
 0x8e4   :  { %2031 = vmatprep.subr.bf16.mxu1 %v2296_v42 }
 0x8e7   :  { %2032 = vmatpush3.bf16.msra.mxu1 %v2297_v3 }
 0x8e8   :  { %2033 = vmatprep.subr.bf16.mxu1 %v2298_v35 }
 0x8eb   :  { %2034 = vmatpush3.bf16.msra.mxu1 %v2299_v26 }
 0x9a4   :  { %v1626_v49 = vpop.f32.mrb[40].mxu0 }
 0x9a5   :  { %v3029_v29 = vadd.f32 %v1626_v49, %v1539_v46  ;;  %v1628_v12 = vpop.f32.mrb[41].mxu0 }
 0x9a6   :  { %v3031_v10 = vadd.f32 %v1628_v12, %v1543_v25  ;;  %v1630_v23 = vpop.f32.mrb[42].mxu0 }
 0x9a7   :  { %v1653_v1 = vmul.f32 0.044715, %v3029_v29  ;;  %v3034_v18 = vadd.f32 %v1630_v23, %v1539_v46  ;;  %v1632_v50 = vpop.f32.mrb[43].mxu0  ;;  %v1645_v23 = vmul.f32 0.5, %v3029_v29 }
 0x9a8   :  { %v1654_v51 = vmul.f32 0.044715, %v3031_v10  ;;  %v3037_v21 = vadd.f32 %v1632_v50, %v1543_v25 }
 0x9a9   :  { %v1661_v7 = vmul.f32 %v1653_v1, %v3029_v29  ;;  %v1655_v6 = vmul.f32 0.044715, %v3034_v18  ;;  %v1647_v1 = vmul.f32 0.5, %v3034_v18 }
 0x9aa   :  { %v1662_v9 = vmul.f32 %v1654_v51, %v3031_v10  ;;  %v1656_v54 = vmul.f32 0.044715, %v3037_v21  ;;  %v1646_v51 = vmul.f32 0.5, %v3031_v10 }
 0x9ab   :  { %v1669_v4 = vmul.f32 %v1661_v7, %v3029_v29  ;;  %v1663_v47 = vmul.f32 %v1655_v6, %v3034_v18  ;;  %v1648_v7 = vmul.f32 0.5, %v3037_v21 }
 0x9ac   :  { %v1670_v24 = vmul.f32 %v1662_v9, %v3031_v10  ;;  %v1664_v57 = vmul.f32 %v1656_v54, %v3037_v21  ;;  %v1636_v58 = vpop.f32.mrb[44].mxu0 }
 0x9ad   :  { %v1677_v59 = vadd.f32 %v1669_v4, %v3029_v29  ;;  %v1671_v60 = vmul.f32 %v1663_v47, %v3034_v18  ;;  %v3049_v61 = vadd.f32 %v1636_v58, %v1539_v46  ;;  %v1638_v14 = vpop.f32.mrb[45].mxu0 }
 0x9ae   :  { %v1672_v28 = vmul.f32 %v1664_v57, %v3037_v21  ;;  %v3052_v30 = vadd.f32 %v1638_v14, %v1543_v25  ;;  %v1640_v62 = vpop.f32.mrb[46].mxu0  ;;  %v1678_v2 = vadd.f32 %v1670_v24, %v3031_v10 }
 0x9af   :  { %v1685_v8 = vmul.f32 0.7978846, %v1677_v59  ;;  %v1679_v13 = vadd.f32 %v1671_v60, %v3034_v18  ;;  %v1657_v41 = vmul.f32 0.044715, %v3049_v61  ;;  %v1641_v15 = vadd.f32 %v1640_v62, %v1539_v46  ;;  %v1642_v16 = vpop.f32.mrb[47].mxu0 }
 0x9b0   :  { %v1658_v56 = vmul.f32 0.044715, %v3052_v30  ;;  %v1643_v5 = vadd.f32 %v1642_v16, %v1543_v25  ;;  %v1680_v31 = vadd.f32 %v1672_v28, %v3037_v21  ;;  %v1686_v43 = vmul.f32 0.7978846, %v1678_v2 }
 0x9b1   :  { %2380 = vtanh.f32 %v1685_v8  ;;  %v1687_v20 = vmul.f32 0.7978846, %v1679_v13  ;;  %v1665_v52 = vmul.f32 %v1657_v41, %v3049_v61  ;;  %v1659_v27 = vmul.f32 0.044715, %v1641_v15 }
 0x9b2   :  { %v1666_v32 = vmul.f32 %v1658_v56, %v3052_v30  ;;  %v1660_v37 = vmul.f32 0.044715, %v1643_v5  ;;  %v1688_v53 = vmul.f32 0.7978846, %v1680_v31  ;;  %2382 = vtanh.f32 %v1686_v43 }
 0x9b3   :  { %2384 = vtanh.f32 %v1687_v20  ;;  %v1673_v55 = vmul.f32 %v1665_v52, %v3049_v61  ;;  %v1667_v19 = vmul.f32 %v1659_v27, %v1641_v15  ;;  %v1649_v18 = vmul.f32 0.5, %v3049_v61  ;;  %v1964_v52 = vld [vmem:[%s3106_s12] ss:$0 sm:$0xff] }
 0x9b4   :  { %v1674_v36 = vmul.f32 %v1666_v32, %v3052_v30  ;;  %v1668_v22 = vmul.f32 %v1660_v37, %v1643_v5  ;;  %2386 = vtanh.f32 %v1688_v53  ;;  %v1651_v10 = vmul.f32 0.5, %v1641_v15 }
 0x9b5   :  { %v1675_v0 = vmul.f32 %v1667_v19, %v1641_v15  ;;  %v1681_v45 = vadd.f32 %v1673_v55, %v3049_v61  ;;  %v1650_v21 = vmul.f32 0.5, %v3052_v30  ;;  %v1652_v2 = vmul.f32 0.5, %v1643_v5 }
 0x9b6   :  { %v1676_v63 = vmul.f32 %v1668_v22, %v1643_v5  ;;  %v1682_v33 = vadd.f32 %v1674_v36, %v3052_v30 }
 0x9b7   :  { %v1683_v39 = vadd.f32 %v1675_v0, %v1641_v15  ;;  %v1689_v40 = vmul.f32 0.7978846, %v1681_v45 }
 0x9b8   :  { %v1684_v34 = vadd.f32 %v1676_v63, %v1643_v5  ;;  %v1690_v42 = vmul.f32 0.7978846, %v1682_v33 }
 0x9b9   :  { %v1691_v3 = vmul.f32 0.7978846, %v1683_v39  ;;  %2388 = vtanh.f32 %v1689_v40 }
 0x9ba   :  { %v1692_v35 = vmul.f32 0.7978846, %v1684_v34  ;;  %2390 = vtanh.f32 %v1690_v42 }
 0x9bb   :  { %v2381_v26 = vpop.eup %2380  ;;  %2392 = vtanh.f32 %v1691_v3 }
 0x9bc   :  { %v2383_v44 = vpop.eup %2382  ;;  %v1701_v46 = vadd.f32 1.0, %v2381_v26  ;;  %2394 = vtanh.f32 %v1692_v35 }
 0x9bd   :  { %v2385_v25 = vpop.eup %2384  ;;  %v1702_v49 = vadd.f32 1.0, %v2383_v44 }
 0x9be   :  { %v2387_v12 = vpop.eup %2386  ;;  %v1703_v50 = vadd.f32 1.0, %v2385_v25  ;;  %v1709_v9 = vmul.f32 %v1701_v46, %v1645_v23 }
 0x9bf   :  { %v1704_v6 = vadd.f32 1.0, %v2387_v12  ;;  %v1710_v4 = vmul.f32 %v1702_v49, %v1646_v51 }
 0x9c0   :  { %v1711_v54 = vmul.f32 %v1703_v50, %v1647_v1 }
 0x9c1   :  { %v1712_v47 = vmul.f32 %v1704_v6, %v1648_v7 }
 0x9c2   :  { %v1717_v24 = vpack.c.bf16 %v1711_v54, %v1709_v9 }
 0x9c3   :  { %v2389_v57 = vpop.eup %2388  ;;  %v1718_v58 = vpack.c.bf16 %v1712_v47, %v1710_v4 }
 0x9c4   :  { %v2391_v59 = vpop.eup %2390  ;;  %v1705_v60 = vadd.f32 1.0, %v2389_v57 }
 0x9c5   :  { %v2393_v14 = vpop.eup %2392  ;;  %1888 = vmatprep.mubr.bf16.mxu1 %v1718_v58  ;;  %v1706_v29 = vadd.f32 1.0, %v2391_v59 }
 0x9c6   :  { %v2395_v28 = vpop.eup %2394  ;;  %1889 = vmatmul.mubr.bf16.vlgmr.msra.gmra.mrb[36].mxu1 %v1717_v24  ;;  %v1707_v62 = vadd.f32 1.0, %v2393_v14  ;;  %v1713_v13 = vmul.f32 %v1705_v60, %v1649_v18 }
 0x9c7   :  { %v1708_v8 = vadd.f32 1.0, %v2395_v28  ;;  %v1714_v16 = vmul.f32 %v1706_v29, %v1650_v21 }
 0x9c8   :  { %v1715_v41 = vmul.f32 %v1707_v62, %v1651_v10 }
 0x9c9   :  { %v1716_v56 = vmul.f32 %v1708_v8, %v1652_v2 }
 0x9ca   :  { %v1719_v31 = vpack.c.bf16 %v1715_v41, %v1713_v13 }
 0x9cb   :  { %v1720_v43 = vpack.c.bf16 %v1716_v56, %v1714_v16 }
 0x9cd   :  { %1896 = vmatprep.mubr.bf16.mxu1 %v1720_v43 }
 0x9ce   :  { %1897 = vmatmul.mubr.bf16.gmra.mrb[40].mxu1 %v1719_v31 }
 0xa99   :  { %v2035_v20 = vpop.f32.mrb[36].mxu1 }
 0xa9a   :  { %v2036_v61 = vpop.f32.mrb[37].mxu1 }
 0xa9b   :  { %v2037_v15 = vadd.f32 %v2036_v61, %v2035_v20  ;;  %v2038_v27 = vpop.f32.mrb[38].mxu1 }
 0xa9c   :  { %v2039_v32 = vpop.f32.mrb[39].mxu1 }
 0xa9d   :  { %v1891_v30 = vadd.f32 %v2037_v15, %v1964_v52  ;;  %v2040_v5 = vadd.f32 %v2039_v32, %v2038_v27 }
 0xa9f   :  { %v1905_v37 = vadd.f32 %v1891_v30, %v2908_v38  ;;  %v1894_v53 = vadd.f32 %v2040_v5, %v1964_v52 }
 0xaa1   :  { %1909 = vst.msk [vmem:[%s3107_s13] sm:$0xff] %vm51_vm0, %v1905_v37  ;;  %v1906_v55 = vadd.f32 %v1894_v53, %v2918_v17  ;;  %v2041_v19 = vpop.f32.mrb[40].mxu1 }
 0xaa2   :  { %v2042_v36 = vpop.f32.mrb[41].mxu1 }
 0xaa3   :  { %1910 = vst.msk [vmem:[%s3107_s13 + $0x8] sm:$0xff] %vm51_vm0, %v1906_v55  ;;  %v2043_v22 = vadd.f32 %v2042_v36, %v2041_v19  ;;  %v2044_v0 = vpop.f32.mrb[42].mxu1 }
 0xaa4   :  { %v2045_v45 = vpop.f32.mrb[43].mxu1 }
 0xaa5   :  { %v1899_v63 = vadd.f32 %v2043_v22, %v1964_v52  ;;  %v2046_v38 = vadd.f32 %v2045_v45, %v2044_v0 }
 0xaa7   :  { %v1907_v33 = vadd.f32 %v1899_v63, %v2913_v48  ;;  %v1902_v39 = vadd.f32 %v2046_v38, %v1964_v52 }
 0xaa9   :  { %1911 = vst.msk [vmem:[%s3107_s13 + $0x10] sm:$0xff] %vm51_vm0, %v1907_v33  ;;  %v1908_v17 = vadd.f32 %v1902_v39, %v2927_v11 }
 0xaab   :  { %1912 = vst.msk [vmem:[%s3107_s13 + $0x18] sm:$0xff] %vm51_vm0, %v1908_v17 }

</bundles_post_ra>
